<compile_context>
chip_gen: v5e
topology: v5e:2x2
jax: 0.10.0
libtpu: 0.0.40
codegen_flags: <defaults>
</compile_context>

<pallas_src>
import jax
import jax.numpy as jnp
from jax import lax
from jax.experimental import pallas as pl
from jax.experimental.pallas import tpu as pltpu

EPS = 1e-5        # PyTorch BatchNorm default eps
NZ = 64           # template tokens (8 x 8)
NX = 256          # search tokens  (16 x 16)
N_TOK = NZ + NX   # 320

_ARB = pltpu.CompilerParams(dimension_semantics=("arbitrary",))


# ----------------------------------------------------------------------------------
# Kernel A: token split + basic1 / basic2 (conv1x1 + folded BN + ReLU), both branches
# ----------------------------------------------------------------------------------

def _basic_kernel(x_ref, wx_ref, bx_ref, wz_ref, bz_ref, x1_ref, z1_ref):
    B = x_ref.shape[0]
    z_parts, x_parts = [], []
    for b in range(B):                       # B is small and static
        tok = x_ref[b]                       # (320, C) tokens-on-sublane
        z_parts.append(tok[:NZ, :])          # (64,  C)
        x_parts.append(tok[NZ:, :])          # (256, C)
    z_all = jnp.concatenate(z_parts, axis=0)     # (B*64,  C)
    x_all = jnp.concatenate(x_parts, axis=0)     # (B*256, C)
    # (C_out, S) = W(C_out, C_in) . tok(S, C_in)^T -- contraction over C_in puts
    # channels on sublanes without any explicit in-kernel transpose.
    dn = (((1,), (1,)), ((), ()))
    yx = lax.dot_general(wx_ref[...], x_all, dn,
                         preferred_element_type=jnp.float32) + bx_ref[...]
    yz = lax.dot_general(wz_ref[...], z_all, dn,
                         preferred_element_type=jnp.float32) + bz_ref[...]
    x1_ref[...] = jnp.maximum(yx, 0.0)
    z1_ref[...] = jnp.maximum(yz, 0.0)


def basic_both(x, wx, bx, wz, bz):
    B, N, C = x.shape
    cc = pl.BlockSpec((C, C), lambda i: (0, 0))
    c1 = pl.BlockSpec((C, 1), lambda i: (0, 0))
    return pl.pallas_call(
        _basic_kernel,
        out_shape=(jax.ShapeDtypeStruct((C, B * NX), jnp.float32),
                   jax.ShapeDtypeStruct((C, B * NZ), jnp.float32)),
        grid=(1,),
        in_specs=[pl.BlockSpec((B, N, C), lambda i: (0, 0, 0)), cc, c1, cc, c1],
        out_specs=(pl.BlockSpec((C, B * NX), lambda i: (0, 0)),
                   pl.BlockSpec((C, B * NZ), lambda i: (0, 0))),
        compiler_params=_ARB,
    )(x, wx, bx.reshape(C, 1), wz, bz.reshape(C, 1))


# ----------------------------------------------------------------------------------
# Kernel B: spectral gating frequency-domain part for both branches
#   (real & imag channel mixes + folded BN + ReLU + complex gate multiply)
# ----------------------------------------------------------------------------------

def _spectral_kernel(xrx_ref, xix_ref, grx_ref, gix_ref,
                     xrz_ref, xiz_ref, grz_ref, giz_ref,
                     wrx_ref, brx_ref, wix_ref, bix_ref,
                     wrz_ref, brz_ref, wiz_ref, biz_ref,
                     orx_ref, oix_ref, orz_ref, oiz_ref):
    def branch(xr, xi, wr, br, wi, bi, gr, gi, o_r, o_i):
        yr = jnp.maximum(jnp.dot(wr[...], xr[...],
                                 preferred_element_type=jnp.float32) + br[...], 0.0)
        yi = jnp.maximum(jnp.dot(wi[...], xi[...],
                                 preferred_element_type=jnp.float32) + bi[...], 0.0)
        g_r, g_i = gr[...], gi[...]
        o_r[...] = yr * g_r - yi * g_i
        o_i[...] = yr * g_i + yi * g_r

    branch(xrx_ref, xix_ref, wrx_ref, brx_ref, wix_ref, bix_ref,
           grx_ref, gix_ref, orx_ref, oix_ref)
    branch(xrz_ref, xiz_ref, wrz_ref, brz_ref, wiz_ref, biz_ref,
           grz_ref, giz_ref, orz_ref, oiz_ref)


def spectral_both(xrx, xix, grx, gix, xrz, xiz, grz, giz,
                  wrx, brx, wix, bix, wrz, brz, wiz, biz):
    C, Sx = xrx.shape
    Sz = xrz.shape[1]
    csx = pl.BlockSpec((C, Sx), lambda i: (0, 0))
    csz = pl.BlockSpec((C, Sz), lambda i: (0, 0))
    cc = pl.BlockSpec((C, C), lambda i: (0, 0))
    c1 = pl.BlockSpec((C, 1), lambda i: (0, 0))
    return pl.pallas_call(
        _spectral_kernel,
        out_shape=(jax.ShapeDtypeStruct((C, Sx), jnp.float32),
                   jax.ShapeDtypeStruct((C, Sx), jnp.float32),
                   jax.ShapeDtypeStruct((C, Sz), jnp.float32),
                   jax.ShapeDtypeStruct((C, Sz), jnp.float32)),
        grid=(1,),
        in_specs=[csx, csx, csx, csx, csz, csz, csz, csz,
                  cc, c1, cc, c1, cc, c1, cc, c1],
        out_specs=(csx, csx, csz, csz),
        compiler_params=_ARB,
    )(xrx, xix, grx, gix, xrz, xiz, grz, giz,
      wrx, brx.reshape(C, 1), wix, bix.reshape(C, 1),
      wrz, brz.reshape(C, 1), wiz, biz.reshape(C, 1))


# ----------------------------------------------------------------------------------
# Kernel C: residual + conv1x1(_2) + shared BN + ReLU + full ECA attention + gate
# ----------------------------------------------------------------------------------

def _post_eca_kernel(sgx_ref, rsx_ref, sgz_ref, rsz_ref,
                     wx_ref, bx_ref, wz_ref, bz_ref, em_ref,
                     ox_ref, oz_ref):
    C, Sx = sgx_ref.shape
    Sz = sgz_ref.shape[1]
    B = Sx // NX

    # residual add + conv1x1 (+ shared folded BN) + ReLU for both branches
    xo = jnp.maximum(jnp.dot(wx_ref[...], sgx_ref[...] + rsx_ref[...],
                             preferred_element_type=jnp.float32) + bx_ref[...], 0.0)
    zo = jnp.maximum(jnp.dot(wz_ref[...], sgz_ref[...] + rsz_ref[...],
                             preferred_element_type=jnp.float32) + bz_ref[...], 0.0)

    # one-hot batch indicator (B, S): lets GAP and the gate broadcast run on the MXU
    def indicator(S, per):
        col = lax.broadcasted_iota(jnp.int32, (B, S), 1)
        row = lax.broadcasted_iota(jnp.int32, (B, S), 0)
        lo = row * per
        return ((col >= lo) & (col < lo + per)).astype(jnp.float32)

    sel_x = indicator(Sx, NX)     # (B, Sx)
    sel_z = indicator(Sz, NZ)     # (B, Sz)

    # ECA: GAP over all 320 tokens per (channel, batch)
    dn = (((1,), (1,)), ((), ()))
    gap = (lax.dot_general(xo, sel_x, dn, preferred_element_type=jnp.float32)
           + lax.dot_general(zo, sel_z, dn, preferred_element_type=jnp.float32)
           ) * (1.0 / N_TOK)                                            # (C, B)
    # k=3 channel conv folded into a (C, C) band matrix + sigmoid
    gate = jax.nn.sigmoid(jnp.dot(em_ref[...], gap,
                                  preferred_element_type=jnp.float32))  # (C, B)

    # broadcast the per-(channel, batch) gate back to token lanes and apply
    ox_ref[...] = xo * jnp.dot(gate, sel_x, preferred_element_type=jnp.float32)
    oz_ref[...] = zo * jnp.dot(gate, sel_z, preferred_element_type=jnp.float32)


def post_conv_eca(sgx, rsx, sgz, rsz, wx, bx, wz, bz, eca_m):
    C, Sx = sgx.shape
    Sz = sgz.shape[1]
    csx = pl.BlockSpec((C, Sx), lambda i: (0, 0))
    csz = pl.BlockSpec((C, Sz), lambda i: (0, 0))
    cc = pl.BlockSpec((C, C), lambda i: (0, 0))
    c1 = pl.BlockSpec((C, 1), lambda i: (0, 0))
    return pl.pallas_call(
        _post_eca_kernel,
        out_shape=(jax.ShapeDtypeStruct((C, Sx), jnp.float32),
                   jax.ShapeDtypeStruct((C, Sz), jnp.float32)),
        grid=(1,),
        in_specs=[csx, csx, csz, csz, cc, c1, cc, c1, cc],
        out_specs=(csx, csz),
        compiler_params=_ARB,
    )(sgx, rsx, sgz, rsz, wx, bx.reshape(C, 1), wz, bz.reshape(C, 1), eca_m)


# ----------------------------------------------------------------------------------
# JAX glue: parameter folding, FFTs, final layout
# ----------------------------------------------------------------------------------

def bn_fold(bn):
    scale = bn["gamma"] / jnp.sqrt(bn["var"] + EPS)
    shift = bn["beta"] - scale * bn["mean"]
    return scale, shift


def fold_conv_bn(conv, bn):
    # y = scale*(W x + b) + shift  ==  (diag(scale) W) x + (scale*b + shift)
    scale, shift = bn_fold(bn)
    return conv["w"] * scale[:, None], scale * conv["b"] + shift


def _spectral_gate(cw, C, B, F):
    # complex_weight: (h, w//2+1, C, 2) -> (C, B*F) real/imag, matching the
    # (C, B, H//2+1, W) spectrum flattening (full FFT over W, real FFT over H).
    gr = jnp.transpose(cw[..., 0], (2, 1, 0)).reshape(C, 1, F)
    gi = jnp.transpose(cw[..., 1], (2, 1, 0)).reshape(C, 1, F)
    gr = jnp.broadcast_to(gr, (C, B, F)).reshape(C, B * F)
    gi = jnp.broadcast_to(gi, (C, B, F)).reshape(C, B * F)
    return gr, gi


def sgblock_forward(x, p):
    """SGBlock.forward -- x: (B, 320, C=8) float32 -> (B, 320, C)."""
    B, N, C = x.shape

    # ---- Kernel A: token split + basic1 / basic2 (conv1x1 + BN + ReLU) ------------
    w1, b1 = fold_conv_bn(p["basic1"]["conv"], p["basic1"]["bn"])
    w2, b2 = fold_conv_bn(p["basic2"]["conv"], p["basic2"]["bn"])
    x1, z1 = basic_both(x, w1, b1, w2, b2)          # (C, B*256), (C, B*64)

    # ---- rfft2: full FFT over W, real FFT over H (matches torch dim=(1,2)) --------
    # TODO(synk): rfft2/irfft2 have no Pallas primitive; computed with jnp.fft glue.
    spec_x = jnp.fft.rfft2(x1.reshape(C, B, 16, 16), axes=(3, 2), norm="ortho")  # (C,B,9,16)
    spec_z = jnp.fft.rfft2(z1.reshape(C, B, 8, 8), axes=(3, 2), norm="ortho")    # (C,B,5,8)
    Fx = spec_x.shape[2] * spec_x.shape[3]
    Fz = spec_z.shape[2] * spec_z.shape[3]

    grx, gix = _spectral_gate(p["stb_x"]["complex_weight"], C, B, Fx)
    grz, giz = _spectral_gate(p["stb_z"]["complex_weight"], C, B, Fz)
    wrx, brx = fold_conv_bn(p["stb_x"]["conv_real"], p["stb_x"]["norm1"])
    wix, bix = fold_conv_bn(p["stb_x"]["conv_imag"], p["stb_x"]["norm2"])
    wrz, brz = fold_conv_bn(p["stb_z"]["conv_real"], p["stb_z"]["norm1"])
    wiz, biz = fold_conv_bn(p["stb_z"]["conv_imag"], p["stb_z"]["norm2"])

    # ---- Kernel B: real/imag channel mixes + BN + ReLU + complex spectral gate ----
    yrx, yix, yrz, yiz = spectral_both(
        spec_x.real.reshape(C, B * Fx), spec_x.imag.reshape(C, B * Fx), grx, gix,
        spec_z.real.reshape(C, B * Fz), spec_z.imag.reshape(C, B * Fz), grz, giz,
        wrx, brx, wix, bix, wrz, brz, wiz, biz)

    # ---- irfft2 back to the spatial domain ----------------------------------------
    sg_x = jnp.fft.irfft2((yrx + 1j * yix).reshape(C, B, Fx // 16, 16),
                          s=(16, 16), axes=(3, 2), norm="ortho").reshape(C, B * NX)
    sg_z = jnp.fft.irfft2((yrz + 1j * yiz).reshape(C, B, Fz // 8, 8),
                          s=(8, 8), axes=(3, 2), norm="ortho").reshape(C, B * NZ)

    # ---- Kernel C: residual + conv1x1(_2) + shared BN + ReLU + ECA + gate ---------
    s_norm, t_norm = bn_fold(p["norm"])
    wxo = p["conv1x1"]["w"] * s_norm[:, None]
    bxo = s_norm * p["conv1x1"]["b"] + t_norm
    wzo = p["conv1x1_2"]["w"] * s_norm[:, None]
    bzo = s_norm * p["conv1x1_2"]["b"] + t_norm
    # ECA conv1d(k=3, pad=1, bias-free) over channels folded into a (C, C) band matrix.
    # TODO(synk): ECAAttention source not provided; canonical bias-free ECA assumed.
    ew = p["eca"]["w"]
    eca_m = (ew[0] * jnp.eye(C, k=-1, dtype=jnp.float32)
             + ew[1] * jnp.eye(C, dtype=jnp.float32)
             + ew[2] * jnp.eye(C, k=1, dtype=jnp.float32))

    out_x, out_z = post_conv_eca(sg_x, x1, sg_z, z1, wxo, bxo, wzo, bzo, eca_m)

    # patch2token + cat((zo, xo), dim=1) -> (B, 320, C); pure 20 KB layout op for XLA.
    out = jnp.concatenate([out_z.reshape(C, B, NZ), out_x.reshape(C, B, NX)], axis=2)
    return jnp.transpose(out, (1, 2, 0))


# ----------------------------------------------------------------------------------
# Deterministic parameter init (shapes follow the PyTorch __init__, dim = 8)
# ----------------------------------------------------------------------------------

def init_params(key, c=8):
    keys = iter(jax.random.split(key, 64))

    def rnd(shape, scale=0.02):
        return jax.random.normal(next(keys), shape, dtype=jnp.float32) * scale

    def bn_params():
        return dict(gamma=1.0 + rnd((c,), 0.1), beta=rnd((c,), 0.1),
                    mean=rnd((c,), 0.1), var=1.0 + jnp.abs(rnd((c,), 0.1)))

    def conv1x1():
        return dict(w=rnd((c, c), 0.1), b=rnd((c,), 0.1))

    def sgn(h, w):
        return dict(norm1=bn_params(), norm2=bn_params(),
                    complex_weight=rnd((h, w // 2 + 1, c, 2), 0.02),
                    conv_real=conv1x1(), conv_imag=conv1x1())

    return dict(
        basic1=dict(conv=conv1x1(), bn=bn_params()),
        basic2=dict(conv=conv1x1(), bn=bn_params()),
        stb_x=sgn(16, 16),
        stb_z=sgn(8, 8),
        conv1x1=conv1x1(),
        conv1x1_2=conv1x1(),
        norm=bn_params(),
        eca=dict(w=rnd((3,), 0.5)),   # canonical ECA: conv1d k=3, bias-free
    )


if __name__ == "__main__":
    key = jax.random.PRNGKey(0)
    pkey, xkey = jax.random.split(key)
    params = init_params(pkey)

    # 320 tokens = 64 template tokens (8x8) + 256 search tokens (16x16); dim = 8.
    B, N, C = 2, 320, 8
    x = jax.random.normal(xkey, (B, N, C), dtype=jnp.float32)

    out = jax.jit(sgblock_forward)(x, params)
    jax.block_until_ready(out)
    assert out.shape == (B, N, C) and out.dtype == jnp.float32
    assert bool(jnp.all(jnp.isfinite(out)))
    print("KERNEL_OK")
</pallas_src>

<mosaic_0001>
module attributes {stable_mosaic.version = 11 : i64} {
  func.func @_basic_kernel(%arg0: i32, %arg1: memref<2x320x8xf32, #tpu.memory_space<vmem>>, %arg2: memref<8x8xf32, #tpu.memory_space<vmem>>, %arg3: memref<8x1xf32, #tpu.memory_space<vmem>>, %arg4: memref<8x8xf32, #tpu.memory_space<vmem>>, %arg5: memref<8x1xf32, #tpu.memory_space<vmem>>, %arg6: memref<8x512xf32, #tpu.memory_space<vmem>>, %arg7: memref<8x128xf32, #tpu.memory_space<vmem>>) attributes {dimension_semantics = [#tpu.dimension_semantics<arbitrary>], iteration_bounds = array<i64: 1>, scalar_prefetch = 0 : i64, scratch_operands = 0 : i64, tpu.core_type = #tpu.core_type<tc>, window_params = [{pipeline_mode = #tpu.pipeline_mode<synchronous>, transform_indices = @transform_0, window_bounds = array<i64: 2, 320, 8>}, {pipeline_mode = #tpu.pipeline_mode<synchronous>, transform_indices = @transform_1, window_bounds = array<i64: 8, 8>}, {pipeline_mode = #tpu.pipeline_mode<synchronous>, transform_indices = @transform_2, window_bounds = array<i64: 8, 1>}, {pipeline_mode = #tpu.pipeline_mode<synchronous>, transform_indices = @transform_3, window_bounds = array<i64: 8, 8>}, {pipeline_mode = #tpu.pipeline_mode<synchronous>, transform_indices = @transform_4, window_bounds = array<i64: 8, 1>}, {pipeline_mode = #tpu.pipeline_mode<synchronous>, transform_indices = @transform_5, window_bounds = array<i64: 8, 512>}, {pipeline_mode = #tpu.pipeline_mode<synchronous>, transform_indices = @transform_6, window_bounds = array<i64: 8, 128>}]} {
    %c0 = arith.constant 0 : index
    %c0_0 = arith.constant 0 : index
    %c0_1 = arith.constant 0 : index
    %0 = vector.load %arg1[%c0, %c0_0, %c0_1] : memref<2x320x8xf32, #tpu.memory_space<vmem>>, vector<1x320x8xf32>
    %1 = vector.shape_cast %0 : vector<1x320x8xf32> to vector<320x8xf32>
    %2 = vector.extract_strided_slice %1 {offsets = [0, 0], sizes = [64, 8], strides = [1, 1]} : vector<320x8xf32> to vector<64x8xf32>
    %3 = vector.extract_strided_slice %1 {offsets = [64, 0], sizes = [256, 8], strides = [1, 1]} : vector<320x8xf32> to vector<256x8xf32>
    %c1 = arith.constant 1 : index
    %c0_2 = arith.constant 0 : index
    %c0_3 = arith.constant 0 : index
    %4 = vector.load %arg1[%c1, %c0_2, %c0_3] : memref<2x320x8xf32, #tpu.memory_space<vmem>>, vector<1x320x8xf32>
    %5 = vector.shape_cast %4 : vector<1x320x8xf32> to vector<320x8xf32>
    %6 = vector.extract_strided_slice %5 {offsets = [0, 0], sizes = [64, 8], strides = [1, 1]} : vector<320x8xf32> to vector<64x8xf32>
    %7 = vector.extract_strided_slice %5 {offsets = [64, 0], sizes = [256, 8], strides = [1, 1]} : vector<320x8xf32> to vector<256x8xf32>
    %8 = tpu.concatenate %2, %6 in 0 : vector<64x8xf32>, vector<64x8xf32> -> vector<128x8xf32>
    %9 = tpu.concatenate %3, %7 in 0 : vector<256x8xf32>, vector<256x8xf32> -> vector<512x8xf32>
    %c0_4 = arith.constant 0 : index
    %c0_5 = arith.constant 0 : index
    %10 = vector.load %arg2[%c0_4, %c0_5] : memref<8x8xf32, #tpu.memory_space<vmem>>, vector<8x8xf32>
    %cst = arith.constant dense<0.000000e+00> : vector<8x512xf32>
    %11 = tpu.matmul %10, %9, %cst {dimension_numbers = #tpu.dot_dimension_numbers<[1], [1], [0], [0], [0, 0, 1, 0], [], []>} : vector<8x8xf32>, vector<512x8xf32>, vector<8x512xf32> -> vector<8x512xf32>
    %c0_6 = arith.constant 0 : index
    %c0_7 = arith.constant 0 : index
    %12 = vector.load %arg3[%c0_6, %c0_7] : memref<8x1xf32, #tpu.memory_space<vmem>>, vector<8x1xf32>
    %13 = vector.broadcast %12 : vector<8x1xf32> to vector<8x512xf32>
    %14 = arith.addf %11, %13 : vector<8x512xf32>
    %c0_8 = arith.constant 0 : index
    %c0_9 = arith.constant 0 : index
    %15 = vector.load %arg4[%c0_8, %c0_9] : memref<8x8xf32, #tpu.memory_space<vmem>>, vector<8x8xf32>
    %cst_10 = arith.constant dense<0.000000e+00> : vector<8x128xf32>
    %16 = tpu.matmul %15, %8, %cst_10 {dimension_numbers = #tpu.dot_dimension_numbers<[1], [1], [0], [0], [0, 0, 1, 0], [], []>} : vector<8x8xf32>, vector<128x8xf32>, vector<8x128xf32> -> vector<8x128xf32>
    %c0_11 = arith.constant 0 : index
    %c0_12 = arith.constant 0 : index
    %17 = vector.load %arg5[%c0_11, %c0_12] : memref<8x1xf32, #tpu.memory_space<vmem>>, vector<8x1xf32>
    %18 = vector.broadcast %17 : vector<8x1xf32> to vector<8x128xf32>
    %19 = arith.addf %16, %18 : vector<8x128xf32>
    %cst_13 = arith.constant 0.000000e+00 : f32
    %20 = vector.broadcast %cst_13 : f32 to vector<8x512xf32>
    %21 = arith.maximumf %14, %20 : vector<8x512xf32>
    %c0_14 = arith.constant 0 : index
    %c0_15 = arith.constant 0 : index
    %22 = vector.load %arg6[%c0_14, %c0_15] : memref<8x512xf32, #tpu.memory_space<vmem>>, vector<8x512xf32>
    tpu.vector_store %arg6[%c0_14, %c0_15], %21 {strides = array<i32>} : memref<8x512xf32, #tpu.memory_space<vmem>>, vector<8x512xf32>,
    %cst_16 = arith.constant 0.000000e+00 : f32
    %23 = vector.broadcast %cst_16 : f32 to vector<8x128xf32>
    %24 = arith.maximumf %19, %23 : vector<8x128xf32>
    %c0_17 = arith.constant 0 : index
    %c0_18 = arith.constant 0 : index
    %25 = vector.load %arg7[%c0_17, %c0_18] : memref<8x128xf32, #tpu.memory_space<vmem>>, vector<8x128xf32>
    tpu.vector_store %arg7[%c0_17, %c0_18], %24 {strides = array<i32>} : memref<8x128xf32, #tpu.memory_space<vmem>>, vector<8x128xf32>,
    return
  }
  func.func @transform_0(%arg0: i32) -> (i32, i32, i32) {
    %c0_i32 = arith.constant 0 : i32
    %c0_i32_0 = arith.constant 0 : i32
    %c0_i32_1 = arith.constant 0 : i32
    %c0_i32_2 = arith.constant 0 : i32
    return %c0_i32, %c0_i32_0, %c0_i32_1 : i32, i32, i32
  }
  func.func @transform_1(%arg0: i32) -> (i32, i32) {
    %c0_i32 = arith.constant 0 : i32
    %c0_i32_0 = arith.constant 0 : i32
    %c0_i32_1 = arith.constant 0 : i32
    return %c0_i32, %c0_i32_0 : i32, i32
  }
  func.func @transform_2(%arg0: i32) -> (i32, i32) {
    %c0_i32 = arith.constant 0 : i32
    %c0_i32_0 = arith.constant 0 : i32
    %c0_i32_1 = arith.constant 0 : i32
    return %c0_i32, %c0_i32_0 : i32, i32
  }
  func.func @transform_3(%arg0: i32) -> (i32, i32) {
    %c0_i32 = arith.constant 0 : i32
    %c0_i32_0 = arith.constant 0 : i32
    %c0_i32_1 = arith.constant 0 : i32
    return %c0_i32, %c0_i32_0 : i32, i32
  }
  func.func @transform_4(%arg0: i32) -> (i32, i32) {
    %c0_i32 = arith.constant 0 : i32
    %c0_i32_0 = arith.constant 0 : i32
    %c0_i32_1 = arith.constant 0 : i32
    return %c0_i32, %c0_i32_0 : i32, i32
  }
  func.func @transform_5(%arg0: i32) -> (i32, i32) {
    %c0_i32 = arith.constant 0 : i32
    %c0_i32_0 = arith.constant 0 : i32
    %c0_i32_1 = arith.constant 0 : i32
    return %c0_i32, %c0_i32_0 : i32, i32
  }
  func.func @transform_6(%arg0: i32) -> (i32, i32) {
    %c0_i32 = arith.constant 0 : i32
    %c0_i32_0 = arith.constant 0 : i32
    %c0_i32_1 = arith.constant 0 : i32
    return %c0_i32, %c0_i32_0 : i32, i32
  }
}

module attributes {stable_mosaic.version = 11 : i64} {
  func.func @_spectral_kernel(%arg0: i32, %arg1: memref<8x288xf32, #tpu.memory_space<vmem>>, %arg2: memref<8x288xf32, #tpu.memory_space<vmem>>, %arg3: memref<8x288xf32, #tpu.memory_space<vmem>>, %arg4: memref<8x288xf32, #tpu.memory_space<vmem>>, %arg5: memref<8x80xf32, #tpu.memory_space<vmem>>, %arg6: memref<8x80xf32, #tpu.memory_space<vmem>>, %arg7: memref<8x80xf32, #tpu.memory_space<vmem>>, %arg8: memref<8x80xf32, #tpu.memory_space<vmem>>, %arg9: memref<8x8xf32, #tpu.memory_space<vmem>>, %arg10: memref<8x1xf32, #tpu.memory_space<vmem>>, %arg11: memref<8x8xf32, #tpu.memory_space<vmem>>, %arg12: memref<8x1xf32, #tpu.memory_space<vmem>>, %arg13: memref<8x8xf32, #tpu.memory_space<vmem>>, %arg14: memref<8x1xf32, #tpu.memory_space<vmem>>, %arg15: memref<8x8xf32, #tpu.memory_space<vmem>>, %arg16: memref<8x1xf32, #tpu.memory_space<vmem>>, %arg17: memref<8x288xf32, #tpu.memory_space<vmem>>, %arg18: memref<8x288xf32, #tpu.memory_space<vmem>>, %arg19: memref<8x80xf32, #tpu.memory_space<vmem>>, %arg20: memref<8x80xf32, #tpu.memory_space<vmem>>) attributes {dimension_semantics = [#tpu.dimension_semantics<arbitrary>], iteration_bounds = array<i64: 1>, scalar_prefetch = 0 : i64, scratch_operands = 0 : i64, tpu.core_type = #tpu.core_type<tc>, window_params = [{pipeline_mode = #tpu.pipeline_mode<synchronous>, transform_indices = @transform_0, window_bounds = array<i64: 8, 288>}, {pipeline_mode = #tpu.pipeline_mode<synchronous>, transform_indices = @transform_1, window_bounds = array<i64: 8, 288>}, {pipeline_mode = #tpu.pipeline_mode<synchronous>, transform_indices = @transform_2, window_bounds = array<i64: 8, 288>}, {pipeline_mode = #tpu.pipeline_mode<synchronous>, transform_indices = @transform_3, window_bounds = array<i64: 8, 288>}, {pipeline_mode = #tpu.pipeline_mode<synchronous>, transform_indices = @transform_4, window_bounds = array<i64: 8, 80>}, {pipeline_mode = #tpu.pipeline_mode<synchronous>, transform_indices = @transform_5, window_bounds = array<i64: 8, 80>}, {pipeline_mode = #tpu.pipeline_mode<synchronous>, transform_indices = @transform_6, window_bounds = array<i64: 8, 80>}, {pipeline_mode = #tpu.pipeline_mode<synchronous>, transform_indices = @transform_7, window_bounds = array<i64: 8, 80>}, {pipeline_mode = #tpu.pipeline_mode<synchronous>, transform_indices = @transform_8, window_bounds = array<i64: 8, 8>}, {pipeline_mode = #tpu.pipeline_mode<synchronous>, transform_indices = @transform_9, window_bounds = array<i64: 8, 1>}, {pipeline_mode = #tpu.pipeline_mode<synchronous>, transform_indices = @transform_10, window_bounds = array<i64: 8, 8>}, {pipeline_mode = #tpu.pipeline_mode<synchronous>, transform_indices = @transform_11, window_bounds = array<i64: 8, 1>}, {pipeline_mode = #tpu.pipeline_mode<synchronous>, transform_indices = @transform_12, window_bounds = array<i64: 8, 8>}, {pipeline_mode = #tpu.pipeline_mode<synchronous>, transform_indices = @transform_13, window_bounds = array<i64: 8, 1>}, {pipeline_mode = #tpu.pipeline_mode<synchronous>, transform_indices = @transform_14, window_bounds = array<i64: 8, 8>}, {pipeline_mode = #tpu.pipeline_mode<synchronous>, transform_indices = @transform_15, window_bounds = array<i64: 8, 1>}, {pipeline_mode = #tpu.pipeline_mode<synchronous>, transform_indices = @transform_16, window_bounds = array<i64: 8, 288>}, {pipeline_mode = #tpu.pipeline_mode<synchronous>, transform_indices = @transform_17, window_bounds = array<i64: 8, 288>}, {pipeline_mode = #tpu.pipeline_mode<synchronous>, transform_indices = @transform_18, window_bounds = array<i64: 8, 80>}, {pipeline_mode = #tpu.pipeline_mode<synchronous>, transform_indices = @transform_19, window_bounds = array<i64: 8, 80>}]} {
    %c0 = arith.constant 0 : index
    %c0_0 = arith.constant 0 : index
    %0 = vector.load %arg9[%c0, %c0_0] : memref<8x8xf32, #tpu.memory_space<vmem>>, vector<8x8xf32>
    %c0_1 = arith.constant 0 : index
    %c0_2 = arith.constant 0 : index
    %1 = vector.load %arg1[%c0_1, %c0_2] : memref<8x288xf32, #tpu.memory_space<vmem>>, vector<8x288xf32>
    %cst = arith.constant dense<0.000000e+00> : vector<8x288xf32>
    %2 = tpu.matmul %0, %1, %cst {dimension_numbers = #tpu.dot_dimension_numbers<[1], [0], [0], [1], [0, 0, 1, 1], [], []>} : vector<8x8xf32>, vector<8x288xf32>, vector<8x288xf32> -> vector<8x288xf32>
    %c0_3 = arith.constant 0 : index
    %c0_4 = arith.constant 0 : index
    %3 = vector.load %arg10[%c0_3, %c0_4] : memref<8x1xf32, #tpu.memory_space<vmem>>, vector<8x1xf32>
    %4 = vector.broadcast %3 : vector<8x1xf32> to vector<8x288xf32>
    %5 = arith.addf %2, %4 : vector<8x288xf32>
    %cst_5 = arith.constant 0.000000e+00 : f32
    %6 = vector.broadcast %cst_5 : f32 to vector<8x288xf32>
    %7 = arith.maximumf %5, %6 : vector<8x288xf32>
    %c0_6 = arith.constant 0 : index
    %c0_7 = arith.constant 0 : index
    %8 = vector.load %arg11[%c0_6, %c0_7] : memref<8x8xf32, #tpu.memory_space<vmem>>, vector<8x8xf32>
    %c0_8 = arith.constant 0 : index
    %c0_9 = arith.constant 0 : index
    %9 = vector.load %arg2[%c0_8, %c0_9] : memref<8x288xf32, #tpu.memory_space<vmem>>, vector<8x288xf32>
    %cst_10 = arith.constant dense<0.000000e+00> : vector<8x288xf32>
    %10 = tpu.matmul %8, %9, %cst_10 {dimension_numbers = #tpu.dot_dimension_numbers<[1], [0], [0], [1], [0, 0, 1, 1], [], []>} : vector<8x8xf32>, vector<8x288xf32>, vector<8x288xf32> -> vector<8x288xf32>
    %c0_11 = arith.constant 0 : index
    %c0_12 = arith.constant 0 : index
    %11 = vector.load %arg12[%c0_11, %c0_12] : memref<8x1xf32, #tpu.memory_space<vmem>>, vector<8x1xf32>
    %12 = vector.broadcast %11 : vector<8x1xf32> to vector<8x288xf32>
    %13 = arith.addf %10, %12 : vector<8x288xf32>
    %cst_13 = arith.constant 0.000000e+00 : f32
    %14 = vector.broadcast %cst_13 : f32 to vector<8x288xf32>
    %15 = arith.maximumf %13, %14 : vector<8x288xf32>
    %c0_14 = arith.constant 0 : index
    %c0_15 = arith.constant 0 : index
    %16 = vector.load %arg3[%c0_14, %c0_15] : memref<8x288xf32, #tpu.memory_space<vmem>>, vector<8x288xf32>
    %c0_16 = arith.constant 0 : index
    %c0_17 = arith.constant 0 : index
    %17 = vector.load %arg4[%c0_16, %c0_17] : memref<8x288xf32, #tpu.memory_space<vmem>>, vector<8x288xf32>
    %18 = arith.mulf %7, %16 : vector<8x288xf32>
    %19 = arith.mulf %15, %17 : vector<8x288xf32>
    %20 = arith.subf %18, %19 : vector<8x288xf32>
    %c0_18 = arith.constant 0 : index
    %c0_19 = arith.constant 0 : index
    %21 = vector.load %arg17[%c0_18, %c0_19] : memref<8x288xf32, #tpu.memory_space<vmem>>, vector<8x288xf32>
    tpu.vector_store %arg17[%c0_18, %c0_19], %20 {strides = array<i32>} : memref<8x288xf32, #tpu.memory_space<vmem>>, vector<8x288xf32>,
    %22 = arith.mulf %7, %17 : vector<8x288xf32>
    %23 = arith.mulf %15, %16 : vector<8x288xf32>
    %24 = arith.addf %22, %23 : vector<8x288xf32>
    %c0_20 = arith.constant 0 : index
    %c0_21 = arith.constant 0 : index
    %25 = vector.load %arg18[%c0_20, %c0_21] : memref<8x288xf32, #tpu.memory_space<vmem>>, vector<8x288xf32>
    tpu.vector_store %arg18[%c0_20, %c0_21], %24 {strides = array<i32>} : memref<8x288xf32, #tpu.memory_space<vmem>>, vector<8x288xf32>,
    %c0_22 = arith.constant 0 : index
    %c0_23 = arith.constant 0 : index
    %26 = vector.load %arg13[%c0_22, %c0_23] : memref<8x8xf32, #tpu.memory_space<vmem>>, vector<8x8xf32>
    %c0_24 = arith.constant 0 : index
    %c0_25 = arith.constant 0 : index
    %27 = vector.load %arg5[%c0_24, %c0_25] : memref<8x80xf32, #tpu.memory_space<vmem>>, vector<8x80xf32>
    %cst_26 = arith.constant dense<0.000000e+00> : vector<8x80xf32>
    %28 = tpu.matmul %26, %27, %cst_26 {dimension_numbers = #tpu.dot_dimension_numbers<[1], [0], [0], [1], [0, 0, 1, 1], [], []>} : vector<8x8xf32>, vector<8x80xf32>, vector<8x80xf32> -> vector<8x80xf32>
    %c0_27 = arith.constant 0 : index
    %c0_28 = arith.constant 0 : index
    %29 = vector.load %arg14[%c0_27, %c0_28] : memref<8x1xf32, #tpu.memory_space<vmem>>, vector<8x1xf32>
    %30 = vector.broadcast %29 : vector<8x1xf32> to vector<8x80xf32>
    %31 = arith.addf %28, %30 : vector<8x80xf32>
    %cst_29 = arith.constant 0.000000e+00 : f32
    %32 = vector.broadcast %cst_29 : f32 to vector<8x80xf32>
    %33 = arith.maximumf %31, %32 : vector<8x80xf32>
    %c0_30 = arith.constant 0 : index
    %c0_31 = arith.constant 0 : index
    %34 = vector.load %arg15[%c0_30, %c0_31] : memref<8x8xf32, #tpu.memory_space<vmem>>, vector<8x8xf32>
    %c0_32 = arith.constant 0 : index
    %c0_33 = arith.constant 0 : index
    %35 = vector.load %arg6[%c0_32, %c0_33] : memref<8x80xf32, #tpu.memory_space<vmem>>, vector<8x80xf32>
    %cst_34 = arith.constant dense<0.000000e+00> : vector<8x80xf32>
    %36 = tpu.matmul %34, %35, %cst_34 {dimension_numbers = #tpu.dot_dimension_numbers<[1], [0], [0], [1], [0, 0, 1, 1], [], []>} : vector<8x8xf32>, vector<8x80xf32>, vector<8x80xf32> -> vector<8x80xf32>
    %c0_35 = arith.constant 0 : index
    %c0_36 = arith.constant 0 : index
    %37 = vector.load %arg16[%c0_35, %c0_36] : memref<8x1xf32, #tpu.memory_space<vmem>>, vector<8x1xf32>
    %38 = vector.broadcast %37 : vector<8x1xf32> to vector<8x80xf32>
    %39 = arith.addf %36, %38 : vector<8x80xf32>
    %cst_37 = arith.constant 0.000000e+00 : f32
    %40 = vector.broadcast %cst_37 : f32 to vector<8x80xf32>
    %41 = arith.maximumf %39, %40 : vector<8x80xf32>
    %c0_38 = arith.constant 0 : index
    %c0_39 = arith.constant 0 : index
    %42 = vector.load %arg7[%c0_38, %c0_39] : memref<8x80xf32, #tpu.memory_space<vmem>>, vector<8x80xf32>
    %c0_40 = arith.constant 0 : index
    %c0_41 = arith.constant 0 : index
    %43 = vector.load %arg8[%c0_40, %c0_41] : memref<8x80xf32, #tpu.memory_space<vmem>>, vector<8x80xf32>
    %44 = arith.mulf %33, %42 : vector<8x80xf32>
    %45 = arith.mulf %41, %43 : vector<8x80xf32>
    %46 = arith.subf %44, %45 : vector<8x80xf32>
    %c0_42 = arith.constant 0 : index
    %c0_43 = arith.constant 0 : index
    %47 = vector.load %arg19[%c0_42, %c0_43] : memref<8x80xf32, #tpu.memory_space<vmem>>, vector<8x80xf32>
    tpu.vector_store %arg19[%c0_42, %c0_43], %46 {strides = array<i32>} : memref<8x80xf32, #tpu.memory_space<vmem>>, vector<8x80xf32>,
    %48 = arith.mulf %33, %43 : vector<8x80xf32>
    %49 = arith.mulf %41, %42 : vector<8x80xf32>
    %50 = arith.addf %48, %49 : vector<8x80xf32>
    %c0_44 = arith.constant 0 : index
    %c0_45 = arith.constant 0 : index
    %51 = vector.load %arg20[%c0_44, %c0_45] : memref<8x80xf32, #tpu.memory_space<vmem>>, vector<8x80xf32>
    tpu.vector_store %arg20[%c0_44, %c0_45], %50 {strides = array<i32>} : memref<8x80xf32, #tpu.memory_space<vmem>>, vector<8x80xf32>,
    return
  }
  func.func @transform_0(%arg0: i32) -> (i32, i32) {
    %c0_i32 = arith.constant 0 : i32
    %c0_i32_0 = arith.constant 0 : i32
    %c0_i32_1 = arith.constant 0 : i32
    return %c0_i32, %c0_i32_0 : i32, i32
  }
  func.func @transform_1(%arg0: i32) -> (i32, i32) {
    %c0_i32 = arith.constant 0 : i32
    %c0_i32_0 = arith.constant 0 : i32
    %c0_i32_1 = arith.constant 0 : i32
    return %c0_i32, %c0_i32_0 : i32, i32
  }
  func.func @transform_2(%arg0: i32) -> (i32, i32) {
    %c0_i32 = arith.constant 0 : i32
    %c0_i32_0 = arith.constant 0 : i32
    %c0_i32_1 = arith.constant 0 : i32
    return %c0_i32, %c0_i32_0 : i32, i32
  }
  func.func @transform_3(%arg0: i32) -> (i32, i32) {
    %c0_i32 = arith.constant 0 : i32
    %c0_i32_0 = arith.constant 0 : i32
    %c0_i32_1 = arith.constant 0 : i32
    return %c0_i32, %c0_i32_0 : i32, i32
  }
  func.func @transform_4(%arg0: i32) -> (i32, i32) {
    %c0_i32 = arith.constant 0 : i32
    %c0_i32_0 = arith.constant 0 : i32
    %c0_i32_1 = arith.constant 0 : i32
    return %c0_i32, %c0_i32_0 : i32, i32
  }
  func.func @transform_5(%arg0: i32) -> (i32, i32) {
    %c0_i32 = arith.constant 0 : i32
    %c0_i32_0 = arith.constant 0 : i32
    %c0_i32_1 = arith.constant 0 : i32
    return %c0_i32, %c0_i32_0 : i32, i32
  }
  func.func @transform_6(%arg0: i32) -> (i32, i32) {
    %c0_i32 = arith.constant 0 : i32
    %c0_i32_0 = arith.constant 0 : i32
    %c0_i32_1 = arith.constant 0 : i32
    return %c0_i32, %c0_i32_0 : i32, i32
  }
  func.func @transform_7(%arg0: i32) -> (i32, i32) {
    %c0_i32 = arith.constant 0 : i32
    %c0_i32_0 = arith.constant 0 : i32
    %c0_i32_1 = arith.constant 0 : i32
    return %c0_i32, %c0_i32_0 : i32, i32
  }
  func.func @transform_8(%arg0: i32) -> (i32, i32) {
    %c0_i32 = arith.constant 0 : i32
    %c0_i32_0 = arith.constant 0 : i32
    %c0_i32_1 = arith.constant 0 : i32
    return %c0_i32, %c0_i32_0 : i32, i32
  }
  func.func @transform_9(%arg0: i32) -> (i32, i32) {
    %c0_i32 = arith.constant 0 : i32
    %c0_i32_0 = arith.constant 0 : i32
    %c0_i32_1 = arith.constant 0 : i32
    return %c0_i32, %c0_i32_0 : i32, i32
  }
  func.func @transform_10(%arg0: i32) -> (i32, i32) {
    %c0_i32 = arith.constant 0 : i32
    %c0_i32_0 = arith.constant 0 : i32
    %c0_i32_1 = arith.constant 0 : i32
    return %c0_i32, %c0_i32_0 : i32, i32
  }
  func.func @transform_11(%arg0: i32) -> (i32, i32) {
    %c0_i32 = arith.constant 0 : i32
    %c0_i32_0 = arith.constant 0 : i32
    %c0_i32_1 = arith.constant 0 : i32
    return %c0_i32, %c0_i32_0 : i32, i32
  }
  func.func @transform_12(%arg0: i32) -> (i32, i32) {
    %c0_i32 = arith.constant 0 : i32
    %c0_i32_0 = arith.constant 0 : i32
    %c0_i32_1 = arith.constant 0 : i32
    return %c0_i32, %c0_i32_0 : i32, i32
  }
  func.func @transform_13(%arg0: i32) -> (i32, i32) {
    %c0_i32 = arith.constant 0 : i32
    %c0_i32_0 = arith.constant 0 : i32
    %c0_i32_1 = arith.constant 0 : i32
    return %c0_i32, %c0_i32_0 : i32, i32
  }
  func.func @transform_14(%arg0: i32) -> (i32, i32) {
    %c0_i32 = arith.constant 0 : i32
    %c0_i32_0 = arith.constant 0 : i32
    %c0_i32_1 = arith.constant 0 : i32
    return %c0_i32, %c0_i32_0 : i32, i32
  }
  func.func @transform_15(%arg0: i32) -> (i32, i32) {
    %c0_i32 = arith.constant 0 : i32
    %c0_i32_0 = arith.constant 0 : i32
    %c0_i32_1 = arith.constant 0 : i32
    return %c0_i32, %c0_i32_0 : i32, i32
  }
  func.func @transform_16(%arg0: i32) -> (i32, i32) {
    %c0_i32 = arith.constant 0 : i32
    %c0_i32_0 = arith.constant 0 : i32
    %c0_i32_1 = arith.constant 0 : i32
    return %c0_i32, %c0_i32_0 : i32, i32
  }
  func.func @transform_17(%arg0: i32) -> (i32, i32) {
    %c0_i32 = arith.constant 0 : i32
    %c0_i32_0 = arith.constant 0 : i32
    %c0_i32_1 = arith.constant 0 : i32
    return %c0_i32, %c0_i32_0 : i32, i32
  }
  func.func @transform_18(%arg0: i32) -> (i32, i32) {
    %c0_i32 = arith.constant 0 : i32
    %c0_i32_0 = arith.constant 0 : i32
    %c0_i32_1 = arith.constant 0 : i32
    return %c0_i32, %c0_i32_0 : i32, i32
  }
  func.func @transform_19(%arg0: i32) -> (i32, i32) {
    %c0_i32 = arith.constant 0 : i32
    %c0_i32_0 = arith.constant 0 : i32
    %c0_i32_1 = arith.constant 0 : i32
    return %c0_i32, %c0_i32_0 : i32, i32
  }
}

module attributes {stable_mosaic.version = 11 : i64} {
  func.func @_post_eca_kernel(%arg0: i32, %arg1: memref<8x512xf32, #tpu.memory_space<vmem>>, %arg2: memref<8x512xf32, #tpu.memory_space<vmem>>, %arg3: memref<8x128xf32, #tpu.memory_space<vmem>>, %arg4: memref<8x128xf32, #tpu.memory_space<vmem>>, %arg5: memref<8x8xf32, #tpu.memory_space<vmem>>, %arg6: memref<8x1xf32, #tpu.memory_space<vmem>>, %arg7: memref<8x8xf32, #tpu.memory_space<vmem>>, %arg8: memref<8x1xf32, #tpu.memory_space<vmem>>, %arg9: memref<8x8xf32, #tpu.memory_space<vmem>>, %arg10: memref<8x512xf32, #tpu.memory_space<vmem>>, %arg11: memref<8x128xf32, #tpu.memory_space<vmem>>) attributes {dimension_semantics = [#tpu.dimension_semantics<arbitrary>], iteration_bounds = array<i64: 1>, scalar_prefetch = 0 : i64, scratch_operands = 0 : i64, tpu.core_type = #tpu.core_type<tc>, window_params = [{pipeline_mode = #tpu.pipeline_mode<synchronous>, transform_indices = @transform_0, window_bounds = array<i64: 8, 512>}, {pipeline_mode = #tpu.pipeline_mode<synchronous>, transform_indices = @transform_1, window_bounds = array<i64: 8, 512>}, {pipeline_mode = #tpu.pipeline_mode<synchronous>, transform_indices = @transform_2, window_bounds = array<i64: 8, 128>}, {pipeline_mode = #tpu.pipeline_mode<synchronous>, transform_indices = @transform_3, window_bounds = array<i64: 8, 128>}, {pipeline_mode = #tpu.pipeline_mode<synchronous>, transform_indices = @transform_4, window_bounds = array<i64: 8, 8>}, {pipeline_mode = #tpu.pipeline_mode<synchronous>, transform_indices = @transform_5, window_bounds = array<i64: 8, 1>}, {pipeline_mode = #tpu.pipeline_mode<synchronous>, transform_indices = @transform_6, window_bounds = array<i64: 8, 8>}, {pipeline_mode = #tpu.pipeline_mode<synchronous>, transform_indices = @transform_7, window_bounds = array<i64: 8, 1>}, {pipeline_mode = #tpu.pipeline_mode<synchronous>, transform_indices = @transform_8, window_bounds = array<i64: 8, 8>}, {pipeline_mode = #tpu.pipeline_mode<synchronous>, transform_indices = @transform_9, window_bounds = array<i64: 8, 512>}, {pipeline_mode = #tpu.pipeline_mode<synchronous>, transform_indices = @transform_10, window_bounds = array<i64: 8, 128>}]} {
    %c0 = arith.constant 0 : index
    %c0_0 = arith.constant 0 : index
    %0 = vector.load %arg5[%c0, %c0_0] : memref<8x8xf32, #tpu.memory_space<vmem>>, vector<8x8xf32>
    %c0_1 = arith.constant 0 : index
    %c0_2 = arith.constant 0 : index
    %1 = vector.load %arg1[%c0_1, %c0_2] : memref<8x512xf32, #tpu.memory_space<vmem>>, vector<8x512xf32>
    %c0_3 = arith.constant 0 : index
    %c0_4 = arith.constant 0 : index
    %2 = vector.load %arg2[%c0_3, %c0_4] : memref<8x512xf32, #tpu.memory_space<vmem>>, vector<8x512xf32>
    %3 = arith.addf %1, %2 : vector<8x512xf32>
    %cst = arith.constant dense<0.000000e+00> : vector<8x512xf32>
    %4 = tpu.matmul %0, %3, %cst {dimension_numbers = #tpu.dot_dimension_numbers<[1], [0], [0], [1], [0, 0, 1, 1], [], []>} : vector<8x8xf32>, vector<8x512xf32>, vector<8x512xf32> -> vector<8x512xf32>
    %c0_5 = arith.constant 0 : index
    %c0_6 = arith.constant 0 : index
    %5 = vector.load %arg6[%c0_5, %c0_6] : memref<8x1xf32, #tpu.memory_space<vmem>>, vector<8x1xf32>
    %6 = vector.broadcast %5 : vector<8x1xf32> to vector<8x512xf32>
    %7 = arith.addf %4, %6 : vector<8x512xf32>
    %cst_7 = arith.constant 0.000000e+00 : f32
    %8 = vector.broadcast %cst_7 : f32 to vector<8x512xf32>
    %9 = arith.maximumf %7, %8 : vector<8x512xf32>
    %c0_8 = arith.constant 0 : index
    %c0_9 = arith.constant 0 : index
    %10 = vector.load %arg7[%c0_8, %c0_9] : memref<8x8xf32, #tpu.memory_space<vmem>>, vector<8x8xf32>
    %c0_10 = arith.constant 0 : index
    %c0_11 = arith.constant 0 : index
    %11 = vector.load %arg3[%c0_10, %c0_11] : memref<8x128xf32, #tpu.memory_space<vmem>>, vector<8x128xf32>
    %c0_12 = arith.constant 0 : index
    %c0_13 = arith.constant 0 : index
    %12 = vector.load %arg4[%c0_12, %c0_13] : memref<8x128xf32, #tpu.memory_space<vmem>>, vector<8x128xf32>
    %13 = arith.addf %11, %12 : vector<8x128xf32>
    %cst_14 = arith.constant dense<0.000000e+00> : vector<8x128xf32>
    %14 = tpu.matmul %10, %13, %cst_14 {dimension_numbers = #tpu.dot_dimension_numbers<[1], [0], [0], [1], [0, 0, 1, 1], [], []>} : vector<8x8xf32>, vector<8x128xf32>, vector<8x128xf32> -> vector<8x128xf32>
    %c0_15 = arith.constant 0 : index
    %c0_16 = arith.constant 0 : index
    %15 = vector.load %arg8[%c0_15, %c0_16] : memref<8x1xf32, #tpu.memory_space<vmem>>, vector<8x1xf32>
    %16 = vector.broadcast %15 : vector<8x1xf32> to vector<8x128xf32>
    %17 = arith.addf %14, %16 : vector<8x128xf32>
    %cst_17 = arith.constant 0.000000e+00 : f32
    %18 = vector.broadcast %cst_17 : f32 to vector<8x128xf32>
    %19 = arith.maximumf %17, %18 : vector<8x128xf32>
    %20 = tpu.iota {dimensions = array<i32: 1>} : vector<2x512xi32>
    %21 = tpu.iota {dimensions = array<i32: 0>} : vector<2x512xi32>
    %c256_i32 = arith.constant 256 : i32
    %22 = vector.broadcast %c256_i32 : i32 to vector<2x512xi32>
    %23 = arith.muli %21, %22 : vector<2x512xi32>
    %24 = arith.cmpi sge, %20, %23 : vector<2x512xi32>
    %c256_i32_18 = arith.constant 256 : i32
    %25 = vector.broadcast %c256_i32_18 : i32 to vector<2x512xi32>
    %26 = arith.addi %23, %25 : vector<2x512xi32>
    %27 = arith.cmpi slt, %20, %26 : vector<2x512xi32>
    %28 = arith.andi %24, %27 : vector<2x512xi1>
    %29 = arith.extui %28 : vector<2x512xi1> to vector<2x512xi32>
    %30 = arith.sitofp %29 : vector<2x512xi32> to vector<2x512xf32>
    %31 = tpu.iota {dimensions = array<i32: 1>} : vector<2x128xi32>
    %32 = tpu.iota {dimensions = array<i32: 0>} : vector<2x128xi32>
    %c64_i32 = arith.constant 64 : i32
    %33 = vector.broadcast %c64_i32 : i32 to vector<2x128xi32>
    %34 = arith.muli %32, %33 : vector<2x128xi32>
    %35 = arith.cmpi sge, %31, %34 : vector<2x128xi32>
    %c64_i32_19 = arith.constant 64 : i32
    %36 = vector.broadcast %c64_i32_19 : i32 to vector<2x128xi32>
    %37 = arith.addi %34, %36 : vector<2x128xi32>
    %38 = arith.cmpi slt, %31, %37 : vector<2x128xi32>
    %39 = arith.andi %35, %38 : vector<2x128xi1>
    %40 = arith.extui %39 : vector<2x128xi1> to vector<2x128xi32>
    %41 = arith.sitofp %40 : vector<2x128xi32> to vector<2x128xf32>
    %cst_20 = arith.constant dense<0.000000e+00> : vector<8x2xf32>
    %42 = tpu.matmul %9, %30, %cst_20 {dimension_numbers = #tpu.dot_dimension_numbers<[1], [1], [0], [0], [0, 0, 1, 0], [], []>} : vector<8x512xf32>, vector<2x512xf32>, vector<8x2xf32> -> vector<8x2xf32>
    %cst_21 = arith.constant dense<0.000000e+00> : vector<8x2xf32>
    %43 = tpu.matmul %19, %41, %cst_21 {dimension_numbers = #tpu.dot_dimension_numbers<[1], [1], [0], [0], [0, 0, 1, 0], [], []>} : vector<8x128xf32>, vector<2x128xf32>, vector<8x2xf32> -> vector<8x2xf32>
    %44 = arith.addf %42, %43 : vector<8x2xf32>
    %cst_22 = arith.constant 3.125000e-03 : f32
    %45 = vector.broadcast %cst_22 : f32 to vector<8x2xf32>
    %46 = arith.mulf %44, %45 : vector<8x2xf32>
    %c0_23 = arith.constant 0 : index
    %c0_24 = arith.constant 0 : index
    %47 = vector.load %arg9[%c0_23, %c0_24] : memref<8x8xf32, #tpu.memory_space<vmem>>, vector<8x8xf32>
    %cst_25 = arith.constant dense<0.000000e+00> : vector<8x2xf32>
    %48 = tpu.matmul %47, %46, %cst_25 {dimension_numbers = #tpu.dot_dimension_numbers<[1], [0], [0], [1], [0, 0, 1, 1], [], []>} : vector<8x8xf32>, vector<8x2xf32>, vector<8x2xf32> -> vector<8x2xf32>
    %49 = arith.negf %48 : vector<8x2xf32>
    %50 = math.exp %49 : vector<8x2xf32>
    %cst_26 = arith.constant 1.000000e+00 : f32
    %51 = vector.broadcast %cst_26 : f32 to vector<8x2xf32>
    %52 = arith.addf %51, %50 : vector<8x2xf32>
    %53 = arith.divf %51, %52 : vector<8x2xf32>
    %cst_27 = arith.constant dense<0.000000e+00> : vector<8x512xf32>
    %54 = tpu.matmul %53, %30, %cst_27 {dimension_numbers = #tpu.dot_dimension_numbers<[1], [0], [0], [1], [0, 0, 1, 1], [], []>} : vector<8x2xf32>, vector<2x512xf32>, vector<8x512xf32> -> vector<8x512xf32>
    %55 = arith.mulf %9, %54 : vector<8x512xf32>
    %c0_28 = arith.constant 0 : index
    %c0_29 = arith.constant 0 : index
    %56 = vector.load %arg10[%c0_28, %c0_29] : memref<8x512xf32, #tpu.memory_space<vmem>>, vector<8x512xf32>
    tpu.vector_store %arg10[%c0_28, %c0_29], %55 {strides = array<i32>} : memref<8x512xf32, #tpu.memory_space<vmem>>, vector<8x512xf32>,
    %cst_30 = arith.constant dense<0.000000e+00> : vector<8x128xf32>
    %57 = tpu.matmul %53, %41, %cst_30 {dimension_numbers = #tpu.dot_dimension_numbers<[1], [0], [0], [1], [0, 0, 1, 1], [], []>} : vector<8x2xf32>, vector<2x128xf32>, vector<8x128xf32> -> vector<8x128xf32>
    %58 = arith.mulf %19, %57 : vector<8x128xf32>
    %c0_31 = arith.constant 0 : index
    %c0_32 = arith.constant 0 : index
    %59 = vector.load %arg11[%c0_31, %c0_32] : memref<8x128xf32, #tpu.memory_space<vmem>>, vector<8x128xf32>
    tpu.vector_store %arg11[%c0_31, %c0_32], %58 {strides = array<i32>} : memref<8x128xf32, #tpu.memory_space<vmem>>, vector<8x128xf32>,
    return
  }
  func.func @transform_0(%arg0: i32) -> (i32, i32) {
    %c0_i32 = arith.constant 0 : i32
    %c0_i32_0 = arith.constant 0 : i32
    %c0_i32_1 = arith.constant 0 : i32
    return %c0_i32, %c0_i32_0 : i32, i32
  }
  func.func @transform_1(%arg0: i32) -> (i32, i32) {
    %c0_i32 = arith.constant 0 : i32
    %c0_i32_0 = arith.constant 0 : i32
    %c0_i32_1 = arith.constant 0 : i32
    return %c0_i32, %c0_i32_0 : i32, i32
  }
  func.func @transform_2(%arg0: i32) -> (i32, i32) {
    %c0_i32 = arith.constant 0 : i32
    %c0_i32_0 = arith.constant 0 : i32
    %c0_i32_1 = arith.constant 0 : i32
    return %c0_i32, %c0_i32_0 : i32, i32
  }
  func.func @transform_3(%arg0: i32) -> (i32, i32) {
    %c0_i32 = arith.constant 0 : i32
    %c0_i32_0 = arith.constant 0 : i32
    %c0_i32_1 = arith.constant 0 : i32
    return %c0_i32, %c0_i32_0 : i32, i32
  }
  func.func @transform_4(%arg0: i32) -> (i32, i32) {
    %c0_i32 = arith.constant 0 : i32
    %c0_i32_0 = arith.constant 0 : i32
    %c0_i32_1 = arith.constant 0 : i32
    return %c0_i32, %c0_i32_0 : i32, i32
  }
  func.func @transform_5(%arg0: i32) -> (i32, i32) {
    %c0_i32 = arith.constant 0 : i32
    %c0_i32_0 = arith.constant 0 : i32
    %c0_i32_1 = arith.constant 0 : i32
    return %c0_i32, %c0_i32_0 : i32, i32
  }
  func.func @transform_6(%arg0: i32) -> (i32, i32) {
    %c0_i32 = arith.constant 0 : i32
    %c0_i32_0 = arith.constant 0 : i32
    %c0_i32_1 = arith.constant 0 : i32
    return %c0_i32, %c0_i32_0 : i32, i32
  }
  func.func @transform_7(%arg0: i32) -> (i32, i32) {
    %c0_i32 = arith.constant 0 : i32
    %c0_i32_0 = arith.constant 0 : i32
    %c0_i32_1 = arith.constant 0 : i32
    return %c0_i32, %c0_i32_0 : i32, i32
  }
  func.func @transform_8(%arg0: i32) -> (i32, i32) {
    %c0_i32 = arith.constant 0 : i32
    %c0_i32_0 = arith.constant 0 : i32
    %c0_i32_1 = arith.constant 0 : i32
    return %c0_i32, %c0_i32_0 : i32, i32
  }
  func.func @transform_9(%arg0: i32) -> (i32, i32) {
    %c0_i32 = arith.constant 0 : i32
    %c0_i32_0 = arith.constant 0 : i32
    %c0_i32_1 = arith.constant 0 : i32
    return %c0_i32, %c0_i32_0 : i32, i32
  }
  func.func @transform_10(%arg0: i32) -> (i32, i32) {
    %c0_i32 = arith.constant 0 : i32
    %c0_i32_0 = arith.constant 0 : i32
    %c0_i32_1 = arith.constant 0 : i32
    return %c0_i32, %c0_i32_0 : i32, i32
  }
}

</mosaic_0001>

<bundles_post_ra>
// kernel: sgblock_forward.3
= control target key start
LH: loop header
LB: loop body
LE: loop exit
PB: predicated region body
PF: predicated region fallthrough
CT: control target
= control target key end

     0   :  { %vm110_vm0 = vcmask 64512   ;;  %s997_s0 = inlined_call_operand.vmem [shape: f32[2,320,8], index: 0, kind: input, shape index: {}]   ;;  %s998_s1 = inlined_call_operand.vmem [shape: f32[8,8], index: 1, kind: input, shape index: {}]   ;;  %s999_s2 = inlined_call_operand.vmem [shape: f32[8,1], index: 2, kind: input, shape index: {}]   ;;  %s1000_s4 = inlined_call_operand.vmem [shape: f32[8,1], index: 4, kind: input, shape index: {}]   ;;  %s1001_s3 = inlined_call_operand.vmem [shape: f32[8,8], index: 3, kind: input, shape index: {}]   ;;  %s1002_s5 = inlined_call_operand.vmem [shape: f32[8,512], index: 5, kind: output, shape index: {0}]   ;;  %s1003_s6 = inlined_call_operand.vmem [shape: f32[8,128], index: 6, kind: output, shape index: {1}]  }
   0x1   :  { %v45_v0 = vld [vmem:[%s997_s0 + $0xb8] sm:$0xff]  ;;  %v44_v1 = vld [vmem:[%s997_s0 + $0xb0] sm:$0xff]  ;;  %v43_v2 = vld [vmem:[%s997_s0 + $0xa8] sm:$0xff] }
   0x2   :  { %522 = vmatpush.xpose.msk.msra.mxu0 %vm110_vm0, %v45_v0  ;;  %v42_v3 = vld [vmem:[%s997_s0 + $0xa0] sm:$0xff]  ;;  %v505_v4 = vld [vmem:[%s997_s0 + $0x1f8] sm:$0xff]  ;;  %v504_v7 = vld [vmem:[%s997_s0 + $0x1f0] sm:$0xff] }
   0x3   :  { %v521_v5 = vld [vmem:[%s997_s0 + $0x278] sm:$0xff]  ;;  %556 = vmatpush.xpose.msk.msra.mxu2 %vm110_vm0, %v505_v4  ;;  %v520_v8 = vld [vmem:[%s997_s0 + $0x270] sm:$0xff]  ;;  %v503_v11 = vld [vmem:[%s997_s0 + $0x1e8] sm:$0xff] }
   0x4   :  { %v41_v6 = vld [vmem:[%s997_s0 + $0x98] sm:$0xff]  ;;  %573 = vmatpush.xpose.msk.msra.mxu3 %vm110_vm0, %v521_v5  ;;  %v40_v9 = vld [vmem:[%s997_s0 + $0x90] sm:$0xff]  ;;  %v519_v12 = vld [vmem:[%s997_s0 + $0x268] sm:$0xff] }
   0x5   :  { %v61_v10 = vld [vmem:[%s997_s0 + $0x138] sm:$0xff]  ;;  %v39_v13 = vld [vmem:[%s997_s0 + $0x88] sm:$0xff]  ;;  %v60_v14 = vld [vmem:[%s997_s0 + $0x130] sm:$0xff] }
   0x6   :  { %523 = vmatpush.xpose.msk.msra.mxu0 %vm110_vm0, %v44_v1  ;;  %539 = vmatpush.xpose.msk.msra.mxu1 %vm110_vm0, %v61_v10  ;;  %v502_v15 = vld [vmem:[%s997_s0 + $0x1e0] sm:$0xff]  ;;  %v59_v18 = vld [vmem:[%s997_s0 + $0x128] sm:$0xff]  ;;  %v37_v19 = vld [vmem:[%s997_s0 + $0x78] sm:$0xff]  ;;  %v609_v10 = vmov 0  }
   0x7   :  { %557 = vmatpush.xpose.msk.msra.mxu2 %vm110_vm0, %v504_v7  ;;  %v518_v16 = vld [vmem:[%s997_s0 + $0x260] sm:$0xff]  ;;  %v501_v20 = vld [vmem:[%s997_s0 + $0x1d8] sm:$0xff]  ;;  %v36_v23 = vld [vmem:[%s997_s0 + $0x70] sm:$0xff]  ;;  %608 = vset.pattern.permute.xlu0 %v609_v10 }
   0x8   :  { %574 = vmatpush.xpose.msk.msra.mxu3 %vm110_vm0, %v520_v8  ;;  %v38_v17 = vld [vmem:[%s997_s0 + $0x80] sm:$0xff]  ;;  %v517_v21 = vld [vmem:[%s997_s0 + $0x258] sm:$0xff]  ;;  %v500_v24 = vld [vmem:[%s997_s0 + $0x1d0] sm:$0xff] }
   0x9   :  { %v58_v22 = vld [vmem:[%s997_s0 + $0x120] sm:$0xff]  ;;  %v516_v25 = vld [vmem:[%s997_s0 + $0x250] sm:$0xff]  ;;  %v57_v26 = vld [vmem:[%s997_s0 + $0x118] sm:$0xff] }
   0xa   :  { %524 = vmatpush.xpose.msk.msra.mxu0 %vm110_vm0, %v43_v2  ;;  %540 = vmatpush.xpose.msk.msra.mxu1 %vm110_vm0, %v60_v14  ;;  %v35_v27 = vld [vmem:[%s997_s0 + $0x68] sm:$0xff]  ;;  %v56_v30 = vld [vmem:[%s997_s0 + $0x110] sm:$0xff]  ;;  %v34_v31 = vld [vmem:[%s997_s0 + $0x60] sm:$0xff] }
   0xb   :  { %558 = vmatpush.xpose.msk.msra.mxu2 %vm110_vm0, %v503_v11  ;;  %v499_v28 = vld [vmem:[%s997_s0 + $0x1c8] sm:$0xff]  ;;  %v498_v32 = vld [vmem:[%s997_s0 + $0x1c0] sm:$0xff]  ;;  %v33_v35 = vld [vmem:[%s997_s0 + $0x58] sm:$0xff] }
   0xc   :  { %575 = vmatpush.xpose.msk.msra.mxu3 %vm110_vm0, %v519_v12  ;;  %v515_v29 = vld [vmem:[%s997_s0 + $0x248] sm:$0xff]  ;;  %v514_v33 = vld [vmem:[%s997_s0 + $0x240] sm:$0xff]  ;;  %v497_v36 = vld [vmem:[%s997_s0 + $0x1b8] sm:$0xff] }
   0xd   :  { %v55_v34 = vld [vmem:[%s997_s0 + $0x108] sm:$0xff]  ;;  %v513_v37 = vld [vmem:[%s997_s0 + $0x238] sm:$0xff]  ;;  %v54_v38 = vld [vmem:[%s997_s0 + $0x100] sm:$0xff] }
   0xe   :  { %525 = vmatpush.xpose.msk.msra.mxu0 %vm110_vm0, %v42_v3  ;;  %541 = vmatpush.xpose.msk.msra.mxu1 %vm110_vm0, %v59_v18  ;;  %v32_v39 = vld [vmem:[%s997_s0 + $0x50] sm:$0xff]  ;;  %v53_v42 = vld [vmem:[%s997_s0 + $0xf8] sm:$0xff]  ;;  %v31_v43 = vld [vmem:[%s997_s0 + $0x48] sm:$0xff] }
   0xf   :  { %559 = vmatpush.xpose.msk.msra.mxu2 %vm110_vm0, %v502_v15  ;;  %v496_v40 = vld [vmem:[%s997_s0 + $0x1b0] sm:$0xff]  ;;  %v495_v44 = vld [vmem:[%s997_s0 + $0x1a8] sm:$0xff]  ;;  %v30_v47 = vld [vmem:[%s997_s0 + $0x40] sm:$0xff] }
  0x10   :  { %576 = vmatpush.xpose.msk.msra.mxu3 %vm110_vm0, %v518_v16  ;;  %v512_v41 = vld [vmem:[%s997_s0 + $0x230] sm:$0xff]  ;;  %v511_v45 = vld [vmem:[%s997_s0 + $0x228] sm:$0xff]  ;;  %v494_v48 = vld [vmem:[%s997_s0 + $0x1a0] sm:$0xff] }
  0x11   :  { %v52_v46 = vld [vmem:[%s997_s0 + $0xf0] sm:$0xff]  ;;  %v510_v49 = vld [vmem:[%s997_s0 + $0x220] sm:$0xff]  ;;  %v489_v50 = vld [vmem:[%s997_s0 + $0x178] sm:$0xff] }
  0x12   :  { %526 = vmatpush.xpose.msk.msra.mxu0 %vm110_vm0, %v41_v6  ;;  %542 = vmatpush.xpose.msk.msra.mxu1 %vm110_vm0, %v58_v22  ;;  %v51_v51 = vld [vmem:[%s997_s0 + $0xe8] sm:$0xff]  ;;  %v493_v52 = vld [vmem:[%s997_s0 + $0x198] sm:$0xff]  ;;  %v488_v54 = vld [vmem:[%s997_s0 + $0x170] sm:$0xff] }
  0x13   :  { %560 = vmatpush.xpose.msk.msra.mxu2 %vm110_vm0, %v501_v20  ;;  %v509_v53 = vld [vmem:[%s997_s0 + $0x218] sm:$0xff]  ;;  %v50_v55 = vld [vmem:[%s997_s0 + $0xe0] sm:$0xff]  ;;  %v492_v56 = vld [vmem:[%s997_s0 + $0x190] sm:$0xff] }
  0x14   :  { %577 = vmatpush.xpose.msk.msra.mxu3 %vm110_vm0, %v517_v21  ;;  %v508_v57 = vld [vmem:[%s997_s0 + $0x210] sm:$0xff]  ;;  %v487_v58 = vld [vmem:[%s997_s0 + $0x168] sm:$0xff]  ;;  %v49_v59 = vld [vmem:[%s997_s0 + $0xd8] sm:$0xff] }
  0x15   :  { %v491_v60 = vld [vmem:[%s997_s0 + $0x188] sm:$0xff]  ;;  %v486_v62 = vld [vmem:[%s997_s0 + $0x160] sm:$0xff]  ;;  %v48_v63 = vld [vmem:[%s997_s0 + $0xd0] sm:$0xff] }
  0x16   :  { %527 = vmatpush.xpose.msk.msra.mxu0 %vm110_vm0, %v40_v9  ;;  %543 = vmatpush.xpose.msk.msra.mxu1 %vm110_vm0, %v57_v26  ;;  %v507_v61 = vld [vmem:[%s997_s0 + $0x208] sm:$0xff]  ;;  %v490_v0 = vld [vmem:[%s997_s0 + $0x180] sm:$0xff]  ;;  %v485_v2 = vld [vmem:[%s997_s0 + $0x158] sm:$0xff] }
  0x17   :  { %561 = vmatpush.xpose.msk.msra.mxu2 %vm110_vm0, %v500_v24  ;;  %v506_v1 = vld [vmem:[%s997_s0 + $0x200] sm:$0xff]  ;;  %v47_v3 = vld [vmem:[%s997_s0 + $0xc8] sm:$0xff]  ;;  %v484_v5 = vld [vmem:[%s997_s0 + $0x150] sm:$0xff] }
  0x18   :  { %578 = vmatpush.xpose.msk.msra.mxu3 %vm110_vm0, %v516_v25  ;;  %v103_v4 = vld [vmem:[%s998_s1] sm:$0xff]  ;;  %v483_v7 = vld [vmem:[%s997_s0 + $0x148] sm:$0xff]  ;;  %v29_v11 = vld [vmem:[%s997_s0 + $0x38] sm:$0xff] }
  0x19   :  { %v46_v6 = vld [vmem:[%s997_s0 + $0xc0] sm:$0xff]  ;;  %v27_v14 = vld [vmem:[%s997_s0 + $0x28] sm:$0xff]  ;;  %v25_v16 = vld [vmem:[%s997_s0 + $0x18] sm:$0xff] }
  0x1a   :  { %528 = vmatpush.xpose.msk.msra.mxu0 %vm110_vm0, %v39_v13  ;;  %544 = vmatpush.xpose.msk.msra.mxu1 %vm110_vm0, %v56_v30  ;;  %v104_v8 = vld [vmem:[%s999_s2] sm:$0xff]  ;;  %v28_v13 = vld [vmem:[%s997_s0 + $0x30] sm:$0xff]  ;;  %v23_v18 = vld [vmem:[%s997_s0 + $0x8] sm:$0xff] }
  0x1b   :  { %562 = vmatpush.xpose.msk.msra.mxu2 %vm110_vm0, %v499_v28  ;;  %v482_v9 = vld [vmem:[%s997_s0 + $0x140] sm:$0xff]  ;;  %107 = vperm.xlu0 %608, %v104_v8  }
  0x1c   :  { %579 = vmatpush.xpose.msk.msra.mxu3 %vm110_vm0, %v515_v29  ;;  %v387_v12 = vld [vmem:[%s1000_s4] sm:$0xff] }
  0x1d   :  { %v26_v15 = vld [vmem:[%s997_s0 + $0x20] sm:$0xff] }
  0x1e   :  { %529 = vmatpush.xpose.msk.msra.mxu0 %vm110_vm0, %v38_v17  ;;  %545 = vmatpush.xpose.msk.msra.mxu1 %vm110_vm0, %v55_v34  ;;  %v24_v17 = vld [vmem:[%s997_s0 + $0x10] sm:$0xff]  ;;  %v386_v20 = vld [vmem:[%s1001_s3] sm:$0xff] }
  0x1f   :  { %563 = vmatpush.xpose.msk.msra.mxu2 %vm110_vm0, %v498_v32 }
  0x20   :  { %580 = vmatpush.xpose.msk.msra.mxu3 %vm110_vm0, %v514_v33 }
  0x22   :  { %530 = vmatpush.xpose.msk.msra.mxu0 %vm110_vm0, %v37_v19  ;;  %546 = vmatpush.xpose.msk.msra.mxu1 %vm110_vm0, %v54_v38  ;;  %v22_v19 = vld [vmem:[%s997_s0] sm:$0xff] }
  0x23   :  { %564 = vmatpush.xpose.msk.msra.mxu2 %vm110_vm0, %v497_v36  ;;  %390 = vperm.xlu0 %608, %v387_v12  }
  0x24   :  { %581 = vmatpush.xpose.msk.msra.mxu3 %vm110_vm0, %v513_v37 }
  0x26   :  { %531 = vmatpush.xpose.msk.msra.mxu0 %vm110_vm0, %v36_v23  ;;  %547 = vmatpush.xpose.msk.msra.mxu1 %vm110_vm0, %v53_v42 }
  0x27   :  { %565 = vmatpush.xpose.msk.msra.mxu2 %vm110_vm0, %v496_v40 }
  0x28   :  { %582 = vmatpush.xpose.msk.msra.mxu3 %vm110_vm0, %v512_v41 }
  0x2a   :  { %532 = vmatpush.xpose.msk.msra.mxu0 %vm110_vm0, %v35_v27  ;;  %548 = vmatpush.xpose.msk.msra.mxu1 %vm110_vm0, %v52_v46 }
  0x2b   :  { %566 = vmatpush.xpose.msk.msra.mxu2 %vm110_vm0, %v495_v44 }
  0x2c   :  { %583 = vmatpush.xpose.msk.msra.mxu3 %vm110_vm0, %v511_v45 }
  0x2e   :  { %533 = vmatpush.xpose.msk.msra.mxu0 %vm110_vm0, %v34_v31  ;;  %549 = vmatpush.xpose.msk.msra.mxu1 %vm110_vm0, %v51_v51 }
  0x2f   :  { %567 = vmatpush.xpose.msk.msra.mxu2 %vm110_vm0, %v494_v48 }
  0x30   :  { %584 = vmatpush.xpose.msk.msra.mxu3 %vm110_vm0, %v510_v49 }
  0x32   :  { %534 = vmatpush.xpose.msk.msra.mxu0 %vm110_vm0, %v33_v35  ;;  %550 = vmatpush.xpose.msk.msra.mxu1 %vm110_vm0, %v50_v55 }
  0x33   :  { %568 = vmatpush.xpose.msk.msra.mxu2 %vm110_vm0, %v493_v52 }
  0x34   :  { %585 = vmatpush.xpose.msk.msra.mxu3 %vm110_vm0, %v509_v53 }
  0x36   :  { %535 = vmatpush.xpose.msk.msra.mxu0 %vm110_vm0, %v32_v39  ;;  %551 = vmatpush.xpose.msk.msra.mxu1 %vm110_vm0, %v49_v59 }
  0x37   :  { %569 = vmatpush.xpose.msk.msra.mxu2 %vm110_vm0, %v492_v56 }
  0x38   :  { %586 = vmatpush.xpose.msk.msra.mxu3 %vm110_vm0, %v508_v57 }
  0x3a   :  { %536 = vmatpush.xpose.msk.msra.mxu0 %vm110_vm0, %v31_v43  ;;  %552 = vmatpush.xpose.msk.msra.mxu1 %vm110_vm0, %v48_v63 }
  0x3b   :  { %570 = vmatpush.xpose.msk.msra.mxu2 %vm110_vm0, %v491_v60 }
  0x3c   :  { %587 = vmatpush.xpose.msk.msra.mxu3 %vm110_vm0, %v507_v61 }
  0x3e   :  { %537 = vmatpush.xpose.msk.msra.mxu0 %vm110_vm0, %v30_v47  ;;  %553 = vmatpush.xpose.msk.msra.mxu1 %vm110_vm0, %v47_v3 }
  0x3f   :  { %571 = vmatpush.xpose.msk.msra.mxu2 %vm110_vm0, %v490_v0 }
  0x40   :  { %588 = vmatpush.xpose.msk.msra.mxu3 %vm110_vm0, %v506_v1 }
  0x41   :  { %538 = vmatmul.msk.f32.vlgmr.msra.gmra.mxu0 %vm110_vm0, %v103_v4 }
  0x42   :  { %590 = vmatpush.xpose.msk.msrb.mxu0 %vm110_vm0, %v489_v50  ;;  %572 = vmatmul.msk.f32.vlgmr.msra.gmra.mxu2 %vm110_vm0, %v103_v4 }
  0x43   :  { %589 = vmatmul.msk.f32.vlgmr.msra.gmra.mxu3 %vm110_vm0, %v103_v4  ;;  %554 = vmatpush.xpose.msk.msra.mxu1 %vm110_vm0, %v46_v6 }
  0x46   :  { %591 = vmatpush.xpose.msk.msrb.mxu0 %vm110_vm0, %v488_v54  ;;  %555 = vmatmul.msk.f32.vlgmr.msra.gmra.mxu1 %vm110_vm0, %v103_v4 }
  0x4a   :  { %592 = vmatpush.xpose.msk.msrb.mxu0 %vm110_vm0, %v487_v58 }
  0x4e   :  { %593 = vmatpush.xpose.msk.msrb.mxu0 %vm110_vm0, %v486_v62 }
  0x52   :  { %594 = vmatpush.xpose.msk.msrb.mxu0 %vm110_vm0, %v485_v2 }
  0x56   :  { %595 = vmatpush.xpose.msk.msrb.mxu0 %vm110_vm0, %v484_v5 }
  0x5a   :  { %596 = vmatpush.xpose.msk.msrb.mxu0 %vm110_vm0, %v483_v7 }
  0x5e   :  { %597 = vmatpush.xpose.msk.msrb.mxu0 %vm110_vm0, %v482_v9 }
  0x62   :  { %598 = vmatpush.xpose.msk.msrb.mxu0 %vm110_vm0, %v29_v11 }
  0x66   :  { %599 = vmatpush.xpose.msk.msrb.mxu0 %vm110_vm0, %v28_v13 }
  0x6a   :  { %600 = vmatpush.xpose.msk.msrb.mxu0 %vm110_vm0, %v27_v14 }
  0x6e   :  { %601 = vmatpush.xpose.msk.msrb.mxu0 %vm110_vm0, %v26_v15 }
  0x72   :  { %602 = vmatpush.xpose.msk.msrb.mxu0 %vm110_vm0, %v25_v16 }
  0x76   :  { %603 = vmatpush.xpose.msk.msrb.mxu0 %vm110_vm0, %v24_v17 }
  0x7a   :  { %604 = vmatpush.xpose.msk.msrb.mxu0 %vm110_vm0, %v23_v18 }
  0x7e   :  { %605 = vmatpush.xpose.msk.msrb.mxu0 %vm110_vm0, %v22_v19 }
  0x81   :  { %606 = vmatmul.msk.f32.vlgmr.msrb.gmra.mxu0 %vm110_vm0, %v386_v20 }
  0x8d   :  { %v108_v21 = vpop.permute.xlu0 %107 }
  0x95   :  { %v391_v34 = vpop.permute.xlu0 %390 }
  0xbe   :  { %v323_v22 = vpop.f32.mrf.mxu0 }
  0xbf   :  { %v324_v23 = vadd.f32 %v323_v22, %v108_v21 }
  0xc1   :  { %v464_v24 = vmax.f32 %v324_v23, 0.0 }
  0xc3   :  { %468 = vst [vmem:[%s1002_s5] sm:$0xff] %v464_v24  ;;  %v343_v25 = vpop.f32.mrf.mxu1 }
  0xc4   :  { %v344_v26 = vadd.f32 %v343_v25, %v108_v21 }
  0xc5   :  { %v363_v27 = vpop.f32.mrf.mxu2 }
  0xc6   :  { %v383_v28 = vpop.f32.mrf.mxu3  ;;  %v364_v29 = vadd.f32 %v363_v27, %v108_v21  ;;  %v465_v31 = vmax.f32 %v344_v26, 0.0 }
  0xc7   :  { %v384_v30 = vadd.f32 %v383_v28, %v108_v21 }
  0xc8   :  { %v466_v32 = vmax.f32 %v364_v29, 0.0  ;;  %469 = vst [vmem:[%s1002_s5 + $0x8] sm:$0xff] %v465_v31 }
  0xc9   :  { %v467_v33 = vmax.f32 %v384_v30, 0.0 }
  0xca   :  { %470 = vst [vmem:[%s1002_s5 + $0x10] sm:$0xff] %v466_v32 }
  0xcb   :  { %471 = vst [vmem:[%s1002_s5 + $0x18] sm:$0xff] %v467_v33 }
  0xfe   :  { %v461_v35 = vpop.f32.mrf.mxu0 }
  0xff   :  { %v462_v36 = vadd.f32 %v461_v35, %v391_v34 }
 0x101   :  { %v472_v37 = vmax.f32 %v462_v36, 0.0 }
 0x103   :  { %473 = vst [vmem:[%s1003_s6] sm:$0xff] %v472_v37 }

// kernel: reverse.3
= control target key start
LH: loop header
LB: loop body
LE: loop exit
PB: predicated region body
PF: predicated region fallthrough
CT: control target
= control target key end

     0   :  { %s80_s0 = inlined_call_operand.vmem [shape: f32[8,2,8,3], index: 0, kind: input, shape index: {}]   ;;  %s81_s1 = inlined_call_operand.vmem [shape: f32[8,2,8,3], index: 1, kind: output, shape index: {}]  }
   0x1   :  { %v24_v0 = vld [vmem:[%s80_s0 + $0x10] sm:$0xff]  ;;  %v25_v1 = vld [vmem:[%s80_s0 + $0x28] sm:$0xff]  ;;  %v29_v3 = vld [vmem:[%s80_s0 + $0x20] sm:$0xff] }
   0x2   :  { %v27_v2 = vld [vmem:[%s80_s0 + $0x8] sm:$0xff]  ;;  %4 = vst [vmem:[%s81_s1] sm:$0xff] %v24_v0  ;;  %v17_v4 = vld [vmem:[%s80_s0] sm:$0xff]  ;;  %v32_v5 = vld [vmem:[%s80_s0 + $0x18] sm:$0xff] }
   0x3   :  { %26 = vst [vmem:[%s81_s1 + $0x18] sm:$0xff] %v25_v1 }
   0x4   :  { %28 = vst [vmem:[%s81_s1 + $0x8] sm:$0xff] %v27_v2 }
   0x5   :  { %30 = vst [vmem:[%s81_s1 + $0x20] sm:$0xff] %v29_v3 }
   0x6   :  { %31 = vst [vmem:[%s81_s1 + $0x10] sm:$0xff] %v17_v4 }
   0x7   :  { %33 = vst [vmem:[%s81_s1 + $0x28] sm:$0xff] %v32_v5 }

// kernel: sgblock_forward.4
= control target key start
LH: loop header
LB: loop body
LE: loop exit
PB: predicated region body
PF: predicated region fallthrough
CT: control target
= control target key end

     0   :  { %vm67_vm0 = vcmask 64512   ;;  %v343_v3 = vmov 0   ;;  %vm227_vm1 = vcmask 261120   ;;  %vm310_vm2 = vcmask 654336   ;;  %s548_s0 = inlined_call_operand.vmem [shape: f32[8,288], index: 0, kind: input, shape index: {}]   ;;  %s549_s1 = inlined_call_operand.vmem [shape: f32[8,288], index: 1, kind: input, shape index: {}]   ;;  %s550_s8 = inlined_call_operand.vmem [shape: f32[8,8], index: 8, kind: input, shape index: {}]   ;;  %s551_s10 = inlined_call_operand.vmem [shape: f32[8,8], index: 10, kind: input, shape index: {}]   ;;  %s552_s4 = inlined_call_operand.vmem [shape: f32[8,80], index: 4, kind: input, shape index: {}]   ;;  %s553_s5 = inlined_call_operand.vmem [shape: f32[8,80], index: 5, kind: input, shape index: {}]   ;;  %s554_s13 = inlined_call_operand.vmem [shape: f32[8,1], index: 13, kind: input, shape index: {}]   ;;  %s555_s9 = inlined_call_operand.vmem [shape: f32[8,1], index: 9, kind: input, shape index: {}]   ;;  %s556_s12 = inlined_call_operand.vmem [shape: f32[8,8], index: 12, kind: input, shape index: {}]   ;;  %s557_s14 = inlined_call_operand.vmem [shape: f32[8,8], index: 14, kind: input, shape index: {}]   ;;  %s558_s15 = inlined_call_operand.vmem [shape: f32[8,1], index: 15, kind: input, shape index: {}]   ;;  %s559_s11 = inlined_call_operand.vmem [shape: f32[8,1], index: 11, kind: input, shape index: {}]   ;;  %s560_s2 = inlined_call_operand.vmem [shape: f32[8,288], index: 2, kind: input, shape index: {}]   ;;  %s561_s3 = inlined_call_operand.vmem [shape: f32[8,288], index: 3, kind: input, shape index: {}]   ;;  %s562_s16 = inlined_call_operand.vmem [shape: f32[8,288], index: 16, kind: output, shape index: {0}]   ;;  %s563_s17 = inlined_call_operand.vmem [shape: f32[8,288], index: 17, kind: output, shape index: {1}]   ;;  %s564_s6 = inlined_call_operand.vmem [shape: f32[8,80], index: 6, kind: input, shape index: {}]   ;;  %s565_s7 = inlined_call_operand.vmem [shape: f32[8,80], index: 7, kind: input, shape index: {}]   ;;  %s566_s18 = inlined_call_operand.vmem [shape: f32[8,80], index: 18, kind: output, shape index: {2}]   ;;  %s567_s19 = inlined_call_operand.vmem [shape: f32[8,80], index: 19, kind: output, shape index: {3}]  }
   0x1   :  { %570 = sst [smem:[#allocation2_spill]] %s548_s0  ;;  %342 = vset.pattern.permute.xlu1 %v343_v3  ;;  %341 = vset.pattern.permute.xlu0 %v343_v3  ;;  %v242_v7 = vld [vmem:[%s552_s4] sm:$0xff]  ;;  %v211_v34 = vld [vmem:[%s560_s2 + $0x8] sm:$0xff]  ;;  %v212_v42 = vld [vmem:[%s560_s2 + $0x10] sm:$0xff] }
   0x2   :  { %571 = sst [smem:[#allocation3_spill]] %s549_s1  ;;  %v274_v8 = vld [vmem:[%s553_s5] sm:$0xff]  ;;  %v214_v35 = vld [vmem:[%s561_s3 + $0x8] sm:$0xff]  ;;  %v215_v47 = vld [vmem:[%s561_s3 + $0x10] sm:$0xff] }
   0x3   :  { %572 = sst [smem:[#allocation4_spill]] %s550_s8  ;;  %v243_v11 = vld [vmem:[%s554_s13] sm:$0xff] }
   0x4   :  { %573 = sst [smem:[#allocation5_spill]] %s551_s10  ;;  %v61_v12 = vld [vmem:[%s555_s9] sm:$0xff]  ;;  %246 = vperm.xlu1 %342, %v243_v11  }
   0x5   :  { %s574_s20 = sld [smem:[#allocation2_spill]]  ;;  %64 = vperm.xlu0 %341, %v61_v12   ;;  %v241_v13 = vld [vmem:[%s556_s12] sm:$0xff] }
   0x6   :  { %s575_s25 = sld [smem:[#allocation3_spill]]  ;;  %v273_v14 = vld [vmem:[%s557_s14] sm:$0xff] }
   0x7   :  { %s576_s27 = sld [smem:[#allocation4_spill]]  ;;  %v275_v15 = vld [vmem:[%s558_s15] sm:$0xff] }
   0x8   :  { %s577_s0 = sld [smem:[#allocation5_spill]]  ;;  %v138_v16 = vld [vmem:[%s559_s11] sm:$0xff] }
   0x9   :  { %v210_v25 = vld [vmem:[%s560_s2] sm:$0xff] }
   0xa   :  { %v213_v26 = vld [vmem:[%s561_s3] sm:$0xff] }
   0xb   :  { %v58_v0 = vld [vmem:[%s574_s20] sm:$0xff]  ;;  %v59_v1 = vld [vmem:[%s574_s20 + $0x8] sm:$0xff]  ;;  %v60_v2 = vld [vmem:[%s574_s20 + $0x10] sm:$0xff] }
   0xc   :  { %86 = vmatpush.msra.mxu0 %v58_v0  ;;  %106 = vmatpush.msra.mxu1 %v59_v1  ;;  %v135_v4 = vld [vmem:[%s575_s25] sm:$0xff]  ;;  %v136_v9 = vld [vmem:[%s575_s25 + $0x8] sm:$0xff]  ;;  %v137_v10 = vld [vmem:[%s575_s25 + $0x10] sm:$0xff] }
   0xd   :  { %v57_v5 = vld [vmem:[%s576_s27] sm:$0xff]  ;;  %126 = vmatpush.msra.mxu2 %v60_v2  ;;  %162 = vmatpush.msra.mxu3 %v135_v4 }
   0xe   :  { %v134_v6 = vld [vmem:[%s577_s0] sm:$0xff]  ;;  %332 = vmatmul.msk.f32.vlgmr.msra.gmra.mxu0 %vm67_vm0, %v57_v5  ;;  %333 = vmatmul.msk.f32.vlgmr.msra.gmra.mxu1 %vm67_vm0, %v57_v5 }
   0xf   :  { %334 = vmatmul.msk.f32.vlgmr.msra.gmra.mxu2 %vm67_vm0, %v57_v5  ;;  %335 = vmatmul.msk.f32.vlgmr.msra.gmra.mxu3 %vm67_vm0, %v134_v6  ;;  %v305_v3 = vld [vmem:[%s564_s6] sm:$0xff] }
  0x10   :  { %267 = vmatpush.msrb.mxu2 %v242_v7  ;;  %299 = vmatpush.msrb.mxu3 %v274_v8  ;;  %v306_v4 = vld [vmem:[%s565_s7] sm:$0xff] }
  0x11   :  { %182 = vmatpush.msrb.mxu0 %v136_v9  ;;  %202 = vmatpush.msrb.mxu1 %v137_v10 }
  0x12   :  { %278 = vperm.xlu1 %342, %v275_v15   ;;  %141 = vperm.xlu0 %341, %v138_v16  }
  0x16   :  { %336 = vmatmul.msk.f32.vlgmr.msrb.gmra.mxu0 %vm67_vm0, %v134_v6  ;;  %337 = vmatmul.msk.f32.vlgmr.msrb.gmra.mxu1 %vm67_vm0, %v134_v6 }
  0x17   :  { %338 = vmatmul.msk.f32.vlgmr.msrb.gmra.mxu2 %vm67_vm0, %v241_v13  ;;  %339 = vmatmul.msk.f32.vlgmr.msrb.gmra.mxu3 %vm67_vm0, %v273_v14 }
  0x76   :  { %v247_v21 = vpop.permute.xlu1 %246 }
  0x77   :  { %v65_v17 = vpop.permute.xlu0 %64 }
  0x84   :  { %v142_v23 = vpop.permute.xlu0 %141  ;;  %v279_v54 = vpop.permute.xlu1 %278 }
  0x8b   :  { %v88_v18 = vpop.f32.mrf.mxu0  ;;  %v108_v19 = vpop.f32.mrf.mxu1 }
  0x8c   :  { %v89_v20 = vadd.f32 %v88_v18, %v65_v17  ;;  %v109_v22 = vadd.f32 %v108_v19, %v65_v17 }
  0x8e   :  { %v131_v24 = vmax.f32 %v89_v20, 0.0  ;;  %v132_v29 = vmax.f32 %v109_v22, 0.0 }
  0x90   :  { %v216_v38 = vmul.f32 %v210_v25, %v131_v24  ;;  %v229_v39 = vmul.f32 %v213_v26, %v131_v24  ;;  %v217_v45 = vmul.f32 %v211_v34, %v132_v29  ;;  %v230_v46 = vmul.f32 %v214_v35, %v132_v29 }
  0x92   :  { %v128_v27 = vpop.f32.mrf.mxu2  ;;  %v164_v28 = vpop.f32.mrf.mxu3 }
  0x93   :  { %v129_v30 = vadd.f32 %v128_v27, %v65_v17  ;;  %v165_v31 = vadd.f32 %v164_v28, %v142_v23  ;;  %v184_v32 = vpop.f32.mrf.mxu0  ;;  %v204_v33 = vpop.f32.mrf.mxu1 }
  0x94   :  { %v185_v36 = vadd.f32 %v184_v32, %v142_v23  ;;  %v205_v37 = vadd.f32 %v204_v33, %v142_v23 }
  0x95   :  { %v133_v40 = vmax.f32 %v129_v30, 0.0  ;;  %v207_v41 = vmax.f32 %v165_v31, 0.0 }
  0x96   :  { %v208_v43 = vmax.f32 %v185_v36, 0.0  ;;  %v209_v44 = vmax.f32 %v205_v37, 0.0 }
  0x97   :  { %v219_v48 = vmul.f32 %v213_v26, %v207_v41  ;;  %v232_v49 = vmul.f32 %v210_v25, %v207_v41  ;;  %v218_v55 = vmul.f32 %v212_v42, %v133_v40  ;;  %v231_v58 = vmul.f32 %v215_v47, %v133_v40 }
  0x98   :  { %v220_v50 = vmul.f32 %v214_v35, %v208_v43  ;;  %v233_v51 = vmul.f32 %v211_v34, %v208_v43  ;;  %v221_v52 = vmul.f32 %v215_v47, %v209_v44  ;;  %v234_v53 = vmul.f32 %v212_v42, %v209_v44 }
  0x99   :  { %v222_v56 = vsub.f32 %v216_v38, %v219_v48  ;;  %v235_v57 = vadd.f32 %v232_v49, %v229_v39 }
  0x9a   :  { %v223_v59 = vsub.f32 %v217_v45, %v220_v50  ;;  %v236_v60 = vadd.f32 %v233_v51, %v230_v46  ;;  %v269_v61 = vpop.f32.mrf.mxu2  ;;  %v301_v62 = vpop.f32.mrf.mxu3  ;;  %v224_v63 = vsub.f32 %v218_v55, %v221_v52  ;;  %v237_v2 = vadd.f32 %v234_v53, %v231_v58 }
  0x9b   :  { %225 = vst [vmem:[%s562_s16] sm:$0xff] %v222_v56  ;;  %v270_v0 = vadd.f32 %v269_v61, %v247_v21  ;;  %v302_v1 = vadd.f32 %v301_v62, %v279_v54 }
  0x9c   :  { %238 = vst [vmem:[%s563_s17] sm:$0xff] %v235_v57 }
  0x9d   :  { %226 = vst [vmem:[%s562_s16 + $0x8] sm:$0xff] %v223_v59  ;;  %v272_v5 = vmax.f32 %v270_v0, 0.0  ;;  %v304_v6 = vmax.f32 %v302_v1, 0.0 }
  0x9e   :  { %239 = vst [vmem:[%s563_s17 + $0x8] sm:$0xff] %v236_v60 }
  0x9f   :  { %228 = vst.msk [vmem:[%s562_s16 + $0x10] sm:$0xff] %vm227_vm1, %v224_v63  ;;  %v307_v7 = vmul.f32 %v305_v3, %v272_v5  ;;  %v312_v8 = vmul.f32 %v306_v4, %v272_v5  ;;  %v308_v9 = vmul.f32 %v306_v4, %v304_v6  ;;  %v313_v10 = vmul.f32 %v305_v3, %v304_v6 }
  0xa0   :  { %240 = vst.msk [vmem:[%s563_s17 + $0x10] sm:$0xff] %vm227_vm1, %v237_v2 }
  0xa1   :  { %v309_v11 = vsub.f32 %v307_v7, %v308_v9  ;;  %v314_v12 = vadd.f32 %v313_v10, %v312_v8 }
  0xa3   :  { %311 = vst.msk [vmem:[%s566_s18] sm:$0xff] %vm310_vm2, %v309_v11 }
  0xa4   :  { %315 = vst.msk [vmem:[%s567_s19] sm:$0xff] %vm310_vm2, %v314_v12 }

// kernel: reverse.0
= control target key start
LH: loop header
LB: loop body
LE: loop exit
PB: predicated region body
PF: predicated region fallthrough
CT: control target
= control target key end

     0   :  { %v104_v10 = vlaneseq  ;;  %v97_v14 = vld [vmem:[#allocation0 + $0x7] ss:$-1 sm:$0xff]  ;;  %v111_v19 = vld [vmem:[#allocation0 + $0x17] ss:$-1 sm:$0xff]  ;;  %s606_s0 = inlined_call_operand.vmem [shape: f32[8,2,16,7], index: 0, kind: input, shape index: {}]   ;;  %s607_s1 = inlined_call_operand.vmem [shape: f32[8,2,16,7], index: 1, kind: output, shape index: {}]  }
   0x1   :  { %v61_v0 = vld [vmem:[%s606_s0] sm:$0xff]  ;;  %v63_v1 = vld [vmem:[%s606_s0 + $0x8] sm:$0xff]  ;;  %v65_v2 = vld [vmem:[%s606_s0 + $0x10] sm:$0xff]  ;;  %v98_v21 = vrot.slane %v97_v14, 1  ;;  %v112_v25 = vrot.slane %v111_v19, 1 }
   0x2   :  { %62 = vst [vmem:[#allocation0 + $0x8] sm:$0xff] %v61_v0  ;;  %v67_v3 = vld [vmem:[%s606_s0 + $0x18] sm:$0xff]  ;;  %v69_v4 = vld [vmem:[%s606_s0 + $0x20] sm:$0xff]  ;;  %v71_v5 = vld [vmem:[%s606_s0 + $0x28] sm:$0xff]  ;;  %v517_v17 = vshrl.u32 %v104_v10, 7 }
   0x3   :  { %64 = vst [vmem:[#allocation0 + $0x18] sm:$0xff] %v63_v1  ;;  %v73_v6 = vld [vmem:[%s606_s0 + $0x30] sm:$0xff]  ;;  %v75_v7 = vld [vmem:[%s606_s0 + $0x38] sm:$0xff]  ;;  %v77_v8 = vld [vmem:[%s606_s0 + $0x40] sm:$0xff] }
   0x4   :  { %66 = vst [vmem:[#allocation0 + $0x28] sm:$0xff] %v65_v2  ;;  %v79_v9 = vld [vmem:[%s606_s0 + $0x48] sm:$0xff]  ;;  %v81_v11 = vld [vmem:[%s606_s0 + $0x50] sm:$0xff]  ;;  %v83_v12 = vld [vmem:[%s606_s0 + $0x58] sm:$0xff]  ;;  %vm106_vm0 = vcmp.lt.s32.totalorder %v517_v17, 7 }
   0x5   :  { %68 = vst [vmem:[#allocation0 + $0x38] sm:$0xff] %v67_v3  ;;  %v85_v13 = vld [vmem:[%s606_s0 + $0x60] sm:$0xff]  ;;  %v87_v15 = vld [vmem:[%s606_s0 + $0x68] sm:$0xff]  ;;  %v89_v18 = vld [vmem:[%s606_s0 + $0x70] sm:$0xff] }
   0x6   :  { %70 = vst [vmem:[#allocation0 + $0x48] sm:$0xff] %v69_v4  ;;  %v91_v20 = vld [vmem:[%s606_s0 + $0x78] sm:$0xff]  ;;  %v125_v24 = vld [vmem:[#allocation0 + $0x27] ss:$-1 sm:$0xff]  ;;  %v139_v28 = vld [vmem:[#allocation0 + $0x37] ss:$-1 sm:$0xff] }
   0x7   :  { %72 = vst [vmem:[#allocation0 + $0x58] sm:$0xff] %v71_v5  ;;  %v126_v29 = vrot.slane %v125_v24, 1  ;;  %v153_v32 = vld [vmem:[#allocation0 + $0x47] ss:$-1 sm:$0xff]  ;;  %v140_v33 = vrot.slane %v139_v28, 1 }
   0x8   :  { %74 = vst [vmem:[#allocation0 + $0x68] sm:$0xff] %v73_v6  ;;  %v167_v36 = vld [vmem:[#allocation0 + $0x57] ss:$-1 sm:$0xff]  ;;  %v154_v37 = vrot.slane %v153_v32, 1  ;;  %v181_v40 = vld [vmem:[#allocation0 + $0x67] ss:$-1 sm:$0xff] }
   0x9   :  { %76 = vst [vmem:[#allocation0 + $0x78] sm:$0xff] %v75_v7  ;;  %v102_v16 = vld [vmem:[#allocation0 + $0xf] ss:$-1 sm:$0xff]  ;;  %v168_v41 = vrot.slane %v167_v36, 1  ;;  %v195_v44 = vld [vmem:[#allocation0 + $0x77] ss:$-1 sm:$0xff] }
   0xa   :  { %78 = vst [vmem:[#allocation0 + $0x88] sm:$0xff] %v77_v8  ;;  %v116_v22 = vld [vmem:[#allocation0 + $0x1f] ss:$-1 sm:$0xff]  ;;  %v103_v23 = vrot.slane %v102_v16, 1  ;;  %v182_v45 = vrot.slane %v181_v40, 1  ;;  %v196_v49 = vrot.slane %v195_v44, 1 }
   0xb   :  { %80 = vst [vmem:[#allocation0 + $0x98] sm:$0xff] %v79_v9  ;;  %v130_v26 = vld [vmem:[#allocation0 + $0x2f] ss:$-1 sm:$0xff]  ;;  %v117_v27 = vrot.slane %v116_v22, 1  ;;  %v209_v48 = vld [vmem:[#allocation0 + $0x87] ss:$-1 sm:$0xff] }
   0xc   :  { %82 = vst [vmem:[#allocation0 + $0xa8] sm:$0xff] %v81_v11  ;;  %v144_v30 = vld [vmem:[#allocation0 + $0x3f] ss:$-1 sm:$0xff]  ;;  %v131_v31 = vrot.slane %v130_v26, 1  ;;  %v223_v52 = vld [vmem:[#allocation0 + $0x97] ss:$-1 sm:$0xff] }
   0xd   :  { %84 = vst [vmem:[#allocation0 + $0xb8] sm:$0xff] %v83_v12  ;;  %v158_v34 = vld [vmem:[#allocation0 + $0x4f] ss:$-1 sm:$0xff]  ;;  %v145_v35 = vrot.slane %v144_v30, 1  ;;  %v210_v53 = vrot.slane %v209_v48, 1  ;;  %v224_v57 = vrot.slane %v223_v52, 1 }
   0xe   :  { %86 = vst [vmem:[#allocation0 + $0xc8] sm:$0xff] %v85_v13  ;;  %v172_v38 = vld [vmem:[#allocation0 + $0x5f] ss:$-1 sm:$0xff]  ;;  %v159_v39 = vrot.slane %v158_v34, 1  ;;  %v237_v56 = vld [vmem:[#allocation0 + $0xa7] ss:$-1 sm:$0xff] }
   0xf   :  { %88 = vst [vmem:[#allocation0 + $0xd8] sm:$0xff] %v87_v15  ;;  %v186_v42 = vld [vmem:[#allocation0 + $0x6f] ss:$-1 sm:$0xff]  ;;  %v173_v43 = vrot.slane %v172_v38, 1  ;;  %v251_v60 = vld [vmem:[#allocation0 + $0xb7] ss:$-1 sm:$0xff] }
  0x10   :  { %90 = vst [vmem:[#allocation0 + $0xe8] sm:$0xff] %v89_v18  ;;  %v200_v46 = vld [vmem:[#allocation0 + $0x7f] ss:$-1 sm:$0xff]  ;;  %v187_v47 = vrot.slane %v186_v42, 1  ;;  %v238_v61 = vrot.slane %v237_v56, 1  ;;  %v252_v1 = vrot.slane %v251_v60, 1 }
  0x11   :  { %92 = vst [vmem:[#allocation0 + $0xf8] sm:$0xff] %v91_v20  ;;  %v214_v50 = vld [vmem:[#allocation0 + $0x8f] ss:$-1 sm:$0xff]  ;;  %v201_v51 = vrot.slane %v200_v46, 1  ;;  %v265_v0 = vld [vmem:[#allocation0 + $0xc7] ss:$-1 sm:$0xff] }
  0x12   :  { %99 = vst [vmem:[#allocation1] sm:$0xff] %v98_v21  ;;  %v228_v54 = vld [vmem:[#allocation0 + $0x9f] ss:$-1 sm:$0xff]  ;;  %v215_v55 = vrot.slane %v214_v50, 1  ;;  %v279_v4 = vld [vmem:[#allocation0 + $0xd7] ss:$-1 sm:$0xff] }
  0x13   :  { %107 = vst.msk [vmem:[#allocation1] sm:$0xff] %vm106_vm0, %v103_v23  ;;  %v242_v58 = vld [vmem:[#allocation0 + $0xaf] ss:$-1 sm:$0xff]  ;;  %v229_v59 = vrot.slane %v228_v54, 1  ;;  %v266_v5 = vrot.slane %v265_v0, 1  ;;  %v280_v9 = vrot.slane %v279_v4, 1 }
  0x14   :  { %113 = vst [vmem:[#allocation1 + $0x8] sm:$0xff] %v112_v25  ;;  %v256_v62 = vld [vmem:[#allocation0 + $0xbf] ss:$-1 sm:$0xff]  ;;  %v243_v63 = vrot.slane %v242_v58, 1  ;;  %v293_v8 = vld [vmem:[#allocation0 + $0xe7] ss:$-1 sm:$0xff] }
  0x15   :  { %121 = vst.msk [vmem:[#allocation1 + $0x8] sm:$0xff] %vm106_vm0, %v117_v27  ;;  %v270_v2 = vld [vmem:[#allocation0 + $0xcf] ss:$-1 sm:$0xff]  ;;  %v257_v3 = vrot.slane %v256_v62, 1  ;;  %v307_v12 = vld [vmem:[#allocation0 + $0xf7] ss:$-1 sm:$0xff] }
  0x16   :  { %127 = vst [vmem:[#allocation1 + $0x10] sm:$0xff] %v126_v29  ;;  %v284_v6 = vld [vmem:[#allocation0 + $0xdf] ss:$-1 sm:$0xff]  ;;  %v271_v7 = vrot.slane %v270_v2, 1  ;;  %v294_v13 = vrot.slane %v293_v8, 1  ;;  %v308_v16 = vrot.slane %v307_v12, 1 }
  0x17   :  { %135 = vst.msk [vmem:[#allocation1 + $0x10] sm:$0xff] %vm106_vm0, %v131_v31  ;;  %v298_v10 = vld [vmem:[#allocation0 + $0xef] ss:$-1 sm:$0xff]  ;;  %v285_v11 = vrot.slane %v284_v6, 1 }
  0x18   :  { %141 = vst [vmem:[#allocation1 + $0x18] sm:$0xff] %v140_v33  ;;  %v312_v14 = vld [vmem:[#allocation0 + $0xff] ss:$-1 sm:$0xff]  ;;  %v299_v15 = vrot.slane %v298_v10, 1 }
  0x19   :  { %149 = vst.msk [vmem:[#allocation1 + $0x18] sm:$0xff] %vm106_vm0, %v145_v35  ;;  %v313_v18 = vrot.slane %v312_v14, 1 }
  0x1a   :  { %155 = vst [vmem:[#allocation1 + $0x20] sm:$0xff] %v154_v37  ;;  %v376_v19 = vld [vmem:[#allocation1] sm:$0xff] }
  0x1b   :  { %163 = vst.msk [vmem:[#allocation1 + $0x20] sm:$0xff] %vm106_vm0, %v159_v39 }
  0x1c   :  { %169 = vst [vmem:[#allocation1 + $0x28] sm:$0xff] %v168_v41  ;;  %v378_v20 = vld [vmem:[#allocation1 + $0x8] sm:$0xff] }
  0x1d   :  { %177 = vst.msk [vmem:[#allocation1 + $0x28] sm:$0xff] %vm106_vm0, %v173_v43 }
  0x1e   :  { %183 = vst [vmem:[#allocation1 + $0x30] sm:$0xff] %v182_v45  ;;  %v380_v17 = vld [vmem:[#allocation1 + $0x10] sm:$0xff] }
  0x1f   :  { %191 = vst.msk [vmem:[#allocation1 + $0x30] sm:$0xff] %vm106_vm0, %v187_v47 }
  0x20   :  { %197 = vst [vmem:[#allocation1 + $0x38] sm:$0xff] %v196_v49  ;;  %v382_v21 = vld [vmem:[#allocation1 + $0x18] sm:$0xff] }
  0x21   :  { %205 = vst.msk [vmem:[#allocation1 + $0x38] sm:$0xff] %vm106_vm0, %v201_v51 }
  0x22   :  { %211 = vst [vmem:[#allocation1 + $0x40] sm:$0xff] %v210_v53  ;;  %v384_v22 = vld [vmem:[#allocation1 + $0x20] sm:$0xff] }
  0x23   :  { %219 = vst.msk [vmem:[#allocation1 + $0x40] sm:$0xff] %vm106_vm0, %v215_v55 }
  0x24   :  { %225 = vst [vmem:[#allocation1 + $0x48] sm:$0xff] %v224_v57  ;;  %v386_v23 = vld [vmem:[#allocation1 + $0x28] sm:$0xff] }
  0x25   :  { %233 = vst.msk [vmem:[#allocation1 + $0x48] sm:$0xff] %vm106_vm0, %v229_v59 }
  0x26   :  { %239 = vst [vmem:[#allocation1 + $0x50] sm:$0xff] %v238_v61  ;;  %v388_v24 = vld [vmem:[#allocation1 + $0x30] sm:$0xff] }
  0x27   :  { %247 = vst.msk [vmem:[#allocation1 + $0x50] sm:$0xff] %vm106_vm0, %v243_v63 }
  0x28   :  { %253 = vst [vmem:[#allocation1 + $0x58] sm:$0xff] %v252_v1  ;;  %v390_v25 = vld [vmem:[#allocation1 + $0x38] sm:$0xff] }
  0x29   :  { %261 = vst.msk [vmem:[#allocation1 + $0x58] sm:$0xff] %vm106_vm0, %v257_v3 }
  0x2a   :  { %267 = vst [vmem:[#allocation1 + $0x60] sm:$0xff] %v266_v5  ;;  %v392_v26 = vld [vmem:[#allocation1 + $0x40] sm:$0xff] }
  0x2b   :  { %275 = vst.msk [vmem:[#allocation1 + $0x60] sm:$0xff] %vm106_vm0, %v271_v7 }
  0x2c   :  { %281 = vst [vmem:[#allocation1 + $0x68] sm:$0xff] %v280_v9  ;;  %v394_v27 = vld [vmem:[#allocation1 + $0x48] sm:$0xff] }
  0x2d   :  { %289 = vst.msk [vmem:[#allocation1 + $0x68] sm:$0xff] %vm106_vm0, %v285_v11 }
  0x2e   :  { %295 = vst [vmem:[#allocation1 + $0x70] sm:$0xff] %v294_v13  ;;  %v396_v28 = vld [vmem:[#allocation1 + $0x50] sm:$0xff] }
  0x2f   :  { %303 = vst.msk [vmem:[#allocation1 + $0x70] sm:$0xff] %vm106_vm0, %v299_v15 }
  0x30   :  { %309 = vst [vmem:[#allocation1 + $0x78] sm:$0xff] %v308_v16  ;;  %v398_v29 = vld [vmem:[#allocation1 + $0x58] sm:$0xff] }
  0x31   :  { %317 = vst.msk [vmem:[#allocation1 + $0x78] sm:$0xff] %vm106_vm0, %v313_v18 }
  0x32   :  { %377 = vst [vmem:[%s607_s1] sm:$0xff] %v376_v19  ;;  %v400_v30 = vld [vmem:[#allocation1 + $0x60] sm:$0xff] }
  0x33   :  { %379 = vst [vmem:[%s607_s1 + $0x8] sm:$0xff] %v378_v20 }
  0x34   :  { %381 = vst [vmem:[%s607_s1 + $0x10] sm:$0xff] %v380_v17  ;;  %v402_v31 = vld [vmem:[#allocation1 + $0x68] sm:$0xff] }
  0x35   :  { %383 = vst [vmem:[%s607_s1 + $0x18] sm:$0xff] %v382_v21 }
  0x36   :  { %385 = vst [vmem:[%s607_s1 + $0x20] sm:$0xff] %v384_v22  ;;  %v404_v32 = vld [vmem:[#allocation1 + $0x70] sm:$0xff] }
  0x37   :  { %387 = vst [vmem:[%s607_s1 + $0x28] sm:$0xff] %v386_v23 }
  0x38   :  { %389 = vst [vmem:[%s607_s1 + $0x30] sm:$0xff] %v388_v24  ;;  %v406_v33 = vld [vmem:[#allocation1 + $0x78] sm:$0xff] }
  0x39   :  { %391 = vst [vmem:[%s607_s1 + $0x38] sm:$0xff] %v390_v25 }
  0x3a   :  { %393 = vst [vmem:[%s607_s1 + $0x40] sm:$0xff] %v392_v26 }
  0x3b   :  { %395 = vst [vmem:[%s607_s1 + $0x48] sm:$0xff] %v394_v27 }
  0x3c   :  { %397 = vst [vmem:[%s607_s1 + $0x50] sm:$0xff] %v396_v28 }
  0x3d   :  { %399 = vst [vmem:[%s607_s1 + $0x58] sm:$0xff] %v398_v29 }
  0x3e   :  { %401 = vst [vmem:[%s607_s1 + $0x60] sm:$0xff] %v400_v30 }
  0x3f   :  { %403 = vst [vmem:[%s607_s1 + $0x68] sm:$0xff] %v402_v31 }
  0x40   :  { %405 = vst [vmem:[%s607_s1 + $0x70] sm:$0xff] %v404_v32 }
  0x41   :  { %407 = vst [vmem:[%s607_s1 + $0x78] sm:$0xff] %v406_v33 }

// kernel: sgblock_forward.5
= control target key start
LH: loop header
LB: loop body
LE: loop exit
PB: predicated region body
PF: predicated region fallthrough
CT: control target
= control target key end

     0   :  { %v528_v3 = vmov 0   ;;  %vm53_vm0 = vcmask 64512   ;;  %v175_v20 = vlaneseq  ;;  %v529_v27 = vmov 1.0   ;;  %s727_s0 = inlined_call_operand.vmem [shape: f32[8,512], index: 0, kind: input, shape index: {}]   ;;  %s728_s1 = inlined_call_operand.vmem [shape: f32[8,512], index: 1, kind: input, shape index: {}]   ;;  %s729_s4 = inlined_call_operand.vmem [shape: f32[8,8], index: 4, kind: input, shape index: {}]   ;;  %s730_s2 = inlined_call_operand.vmem [shape: f32[8,128], index: 2, kind: input, shape index: {}]   ;;  %s731_s3 = inlined_call_operand.vmem [shape: f32[8,128], index: 3, kind: input, shape index: {}]   ;;  %s732_s5 = inlined_call_operand.vmem [shape: f32[8,1], index: 5, kind: input, shape index: {}]   ;;  %s733_s6 = inlined_call_operand.vmem [shape: f32[8,8], index: 6, kind: input, shape index: {}]   ;;  %s734_s7 = inlined_call_operand.vmem [shape: f32[8,1], index: 7, kind: input, shape index: {}]   ;;  %s735_s8 = inlined_call_operand.vmem [shape: f32[8,8], index: 8, kind: input, shape index: {}]   ;;  %s736_s9 = inlined_call_operand.vmem [shape: f32[8,512], index: 9, kind: output, shape index: {0}]   ;;  %s737_s10 = inlined_call_operand.vmem [shape: f32[8,128], index: 10, kind: output, shape index: {1}]  }
   0x1   :  { %v35_v0 = vld [vmem:[%s727_s0] sm:$0xff]  ;;  %v36_v2 = vld [vmem:[%s727_s0 + $0x8] sm:$0xff]  ;;  %523 = vset.pattern.permute.xlu0 %v528_v3  ;;  %v37_v6 = vld [vmem:[%s727_s0 + $0x10] sm:$0xff] }
   0x2   :  { %v39_v1 = vld [vmem:[%s728_s1] sm:$0xff]  ;;  %v40_v5 = vld [vmem:[%s728_s1 + $0x8] sm:$0xff]  ;;  %v41_v7 = vld [vmem:[%s728_s1 + $0x10] sm:$0xff]  ;;  %v181_v21 = vshrl.u32 %v175_v20, 7  ;;  %v176_v22 = vand.u32 127, %v175_v20 }
   0x3   :  { %v43_v4 = vadd.f32 %v39_v1, %v35_v0  ;;  %v44_v8 = vadd.f32 %v40_v5, %v36_v2  ;;  %v45_v9 = vadd.f32 %v41_v7, %v37_v6  ;;  %v38_v10 = vld [vmem:[%s727_s0 + $0x18] sm:$0xff]  ;;  %v34_v12 = vld [vmem:[%s729_s4] sm:$0xff]  ;;  %v530_v0 = vmov 0.0  }
   0x4   :  { %v42_v11 = vld [vmem:[%s728_s1 + $0x18] sm:$0xff]  ;;  %v142_v14 = vld [vmem:[%s730_s2] sm:$0xff]  ;;  %v182_v23 = vmul.u32 256, %v181_v21  ;;  %v177_v25 = vadd.s32 128, %v176_v22  ;;  %v178_v29 = vadd.s32 256, %v176_v22  ;;  %v204_v30 = vmul.u32 64, %v181_v21 }
   0x5   :  { %72 = vmatpush.msra.mxu0 %v43_v4  ;;  %v46_v13 = vadd.f32 %v42_v11, %v38_v10  ;;  %v143_v15 = vld [vmem:[%s731_s3] sm:$0xff]  ;;  %92 = vmatpush.msra.mxu1 %v44_v8  ;;  %v179_v34 = vadd.s32 384, %v176_v22 }
   0x6   :  { %112 = vmatpush.msra.mxu2 %v45_v9  ;;  %v47_v16 = vld [vmem:[%s732_s5] sm:$0xff]  ;;  %v144_v17 = vadd.f32 %v143_v15, %v142_v14  ;;  %493 = vmatmul.msk.f32.vlgmr.msra.gmra.mxu0 %vm53_vm0, %v34_v12  ;;  %v187_v24 = vadd.s32 256, %v182_v23  ;;  %vm183_vm1 = vcmp.ge.s32.totalorder %v176_v22, %v182_v23  ;;  %vm184_vm3 = vcmp.ge.s32.totalorder %v177_v25, %v182_v23 }
   0x7   :  { %132 = vmatpush.msra.mxu3 %v46_v13  ;;  %494 = vmatmul.msk.f32.vlgmr.msra.gmra.mxu1 %vm53_vm0, %v34_v12  ;;  %v141_v18 = vld [vmem:[%s733_s6] sm:$0xff]  ;;  %vm185_vm7 = vcmp.ge.s32.totalorder %v178_v29, %v182_v23  ;;  %v206_v31 = vadd.s32 64, %v204_v30  ;;  %vm205_vm10 = vcmp.ge.s32.totalorder %v176_v22, %v204_v30  ;;  %vm186_vm13 = vcmp.ge.s32.totalorder %v179_v34, %v182_v23 }
   0x8   :  { %495 = vmatmul.msk.f32.vlgmr.msra.gmra.mxu2 %vm53_vm0, %v34_v12  ;;  %496 = vmatmul.msk.f32.vlgmr.msra.gmra.mxu3 %vm53_vm0, %v34_v12  ;;  %v145_v19 = vld [vmem:[%s734_s7] sm:$0xff]  ;;  %vm188_vm2 = vcmp.lt.s32.totalorder %v176_v22, %v187_v24  ;;  %vm189_vm4 = vcmp.lt.s32.totalorder %v177_v25, %v187_v24  ;;  %vm190_vm8 = vcmp.lt.s32.totalorder %v178_v29, %v187_v24 }
   0x9   :  { %50 = vperm.xlu0 %523, %v47_v16   ;;  %169 = vmatpush.msrb.mxu0 %v144_v17  ;;  %vm633_vm5 = vmand %vm183_vm1, %vm188_vm2  ;;  %vm207_vm11 = vcmp.lt.s32.totalorder %v176_v22, %v206_v31  ;;  %vm191_vm14 = vcmp.lt.s32.totalorder %v179_v34, %v187_v24  ;;  %v312_v63 = vld [vmem:[%s735_s8] sm:$0xff]  ;;  %vm359_vm1 = vcmask 1041408  }
   0xa   :  { %504 = vmatpush.xpose.msk.msrb.mxu2 %vm633_vm5, %v529_v27  ;;  %vm639_vm6 = vmand %vm184_vm3, %vm189_vm4  ;;  %v498_v1 = vsel %vm633_vm5, 1.0, %v530_v0  ;;  %vm355_vm4 = vcmask 15360  }
   0xb   :  { %505 = vmatpush.xpose.msk.msrb.mxu3 %vm639_vm6, %v529_v27  ;;  %vm645_vm9 = vmand %vm185_vm7, %vm190_vm8  ;;  %v499_v2 = vsel %vm639_vm6, 1.0, %v530_v0 }
   0xc   :  { %506 = vmatpush.xpose.msk.msra.mxu0 %vm645_vm9, %v529_v27  ;;  %vm651_vm12 = vmand %vm205_vm10, %vm207_vm11  ;;  %v500_v4 = vsel %vm645_vm9, 1.0, %v530_v0 }
   0xd   :  { %503 = vmatpush.xpose.msk.msrb.mxu1 %vm651_vm12, %v529_v27  ;;  %vm657_vm15 = vmand %vm186_vm13, %vm191_vm14  ;;  %v502_v3 = vsel %vm651_vm12, 1.0, %v530_v0 }
   0xe   :  { %497 = vmatmul.msk.f32.vlgmr.msrb.gmra.mxu0 %vm53_vm0, %v141_v18  ;;  %v501_v5 = vsel %vm657_vm15, 1.0, %v530_v0 }
   0xf   :  { %510 = vmatpush.msk.msra.mxu3 %vm359_vm1, %v498_v1 }
  0x10   :  { %512 = vmatpush.msk.msrb.mxu0 %vm359_vm1, %v499_v2 }
  0x11   :  { %148 = vperm.xlu0 %523, %v145_v19   ;;  %507 = vmatpush.xpose.msk.msra.mxu1 %vm657_vm15, %v529_v27 }
  0x7b   :  { %v51_v36 = vpop.permute.xlu0 %50 }
  0x83   :  { %v74_v37 = vpop.f32.mrf.mxu0  ;;  %v149_v44 = vpop.permute.xlu0 %148 }
  0x84   :  { %v663_v38 = vadd.f32 %v74_v37, %v51_v36  ;;  %v94_v39 = vpop.f32.mrf.mxu1 }
  0x85   :  { %v665_v40 = vadd.f32 %v94_v39, %v51_v36 }
  0x86   :  { %v137_v41 = vmax.f32 %v663_v38, 0.0 }
  0x87   :  { %v138_v42 = vmax.f32 %v665_v40, 0.0 }
  0x88   :  { %247 = vmatmul.f32.vlgmr.msrb.gmra.mxu2 %v137_v41 }
  0x89   :  { %267 = vmatmul.f32.vlgmr.msrb.gmra.mxu3 %v138_v42 }
  0x8a   :  { %518 = vmatpush.msk.msrb.mxu3 %vm359_vm1, %v502_v3 }
  0x8b   :  { %v114_v43 = vpop.f32.mrf.mxu2  ;;  %v171_v46 = vpop.f32.mrf.mxu0 }
  0x8c   :  { %v673_v45 = vadd.f32 %v114_v43, %v51_v36  ;;  %v675_v47 = vadd.f32 %v171_v46, %v149_v44  ;;  %v134_v50 = vpop.f32.mrf.mxu3 }
  0x8d   :  { %v683_v51 = vadd.f32 %v134_v50, %v51_v36 }
  0x8e   :  { %v139_v48 = vmax.f32 %v673_v45, 0.0  ;;  %v174_v49 = vmax.f32 %v675_v47, 0.0 }
  0x8f   :  { %v140_v52 = vmax.f32 %v683_v51, 0.0 }
  0x90   :  { %287 = vmatmul.f32.vlgmr.msra.gmra.mxu0 %v139_v48  ;;  %227 = vmatmul.f32.vlgmr.msrb.gmra.mxu1 %v174_v49 }
  0x91   :  { %514 = vmatpush.msk.msrb.mxu1 %vm359_vm1, %v500_v4 }
  0x98   :  { %307 = vmatmul.f32.vlgmr.msra.gmra.mxu1 %v140_v52 }
 0x10b   :  { %v248_v53 = vpop.f32.mrf.mxu2 }
 0x10c   :  { %v268_v56 = vpop.f32.mrf.mxu3 }
 0x10d   :  { %v228_v54 = vpop.f32.mrf.mxu1  ;;  %v288_v58 = vpop.f32.mrf.mxu0 }
 0x10e   :  { %v249_v55 = vadd.f32 %v248_v53, %v228_v54 }
 0x110   :  { %v269_v57 = vadd.f32 %v268_v56, %v249_v55 }
 0x112   :  { %v289_v59 = vadd.f32 %v288_v58, %v269_v57 }
 0x115   :  { %v308_v60 = vpop.f32.mrf.mxu1 }
 0x116   :  { %v309_v61 = vadd.f32 %v308_v60, %v289_v59 }
 0x118   :  { %v311_v62 = vmul.f32 0.003125, %v309_v61 }
 0x11a   :  { %331 = vmatpush.msra.mxu2 %v311_v62 }
 0x11b   :  { %508 = vmatmul.msk.f32.vlgmr.msra.gmra.mxu2 %vm53_vm0, %v312_v63 }
 0x11c   :  { %516 = vmatpush.msk.msrb.mxu2 %vm359_vm1, %v501_v5 }
 0x19e   :  { %v333_v6 = vpop.f32.mrf.mxu2 }
 0x19f   :  { %v509_v7 = vmul.f32 -1.442695, %v333_v6 }
 0x1a1   :  { %524 = vpow2.f32 %v509_v7 }
 0x1a7   :  { %v525_v8 = vpop.eup %524 }
 0x1a8   :  { %v339_v9 = vadd.f32 1.0, %v525_v8 }
 0x1aa   :  { %526 = vrcp.f32 %v339_v9  ;;  %v351_v13 = vand.u32 2147483648, %v339_v9  ;;  %v349_v15 = vand.u32 2147483647, %v339_v9  ;;  %vm345_vm2 = vweird.f32 %v339_v9 }
 0x1ac   :  { %v352_v17 = vor.u32 1.1754944e-38, %v351_v13  ;;  %vm350_vm5 = vcmp.eq.f32.partialorder %v349_v15, 8.507059e+37 }
 0x1b0   :  { %v527_v10 = vpop.eup %526 }
 0x1b1   :  { %v341_v11 = vmul.f32 %v527_v10, %v339_v9  ;;  %vm346_vm0 = vweird.f32 %v527_v10 }
 0x1b2   :  { %vm347_vm3 = vmor %vm345_vm2, %vm346_vm0 }
 0x1b3   :  { %v342_v12 = vsub.f32 1.0, %v341_v11 }
 0x1b5   :  { %v343_v14 = vmul.f32 %v527_v10, %v342_v12 }
 0x1b7   :  { %v344_v16 = vadd.f32 %v527_v10, %v343_v14 }
 0x1b9   :  { %v348_v18 = vsel %vm347_vm3, %v527_v10, %v344_v16 }
 0x1ba   :  { %v353_v19 = vsel %vm350_vm5, %v352_v17, %v348_v18 }
 0x1bb   :  { %511 = vmatmul.msk.f32.vlgmr.msra.gmra.mxu3 %vm355_vm4, %v353_v19  ;;  %513 = vmatmul.msk.f32.vlgmr.msrb.gmra.mxu0 %vm355_vm4, %v353_v19 }
 0x1bc   :  { %515 = vmatmul.msk.f32.vlgmr.msrb.gmra.mxu1 %vm355_vm4, %v353_v19  ;;  %517 = vmatmul.msk.f32.vlgmr.msrb.gmra.mxu2 %vm355_vm4, %v353_v19 }
 0x1c3   :  { %519 = vmatmul.msk.f32.vlgmr.msrb.gmra.mxu3 %vm355_vm4, %v353_v19 }
 0x238   :  { %v409_v20 = vpop.f32.mrf.mxu0 }
 0x239   :  { %v453_v21 = vmul.f32 %v409_v20, %v138_v42  ;;  %v429_v22 = vpop.f32.mrf.mxu1 }
 0x23a   :  { %v454_v23 = vmul.f32 %v429_v22, %v139_v48 }
 0x23b   :  { %457 = vst [vmem:[%s736_s9 + $0x8] sm:$0xff] %v453_v21 }
 0x23c   :  { %458 = vst [vmem:[%s736_s9 + $0x10] sm:$0xff] %v454_v23 }
 0x23e   :  { %v389_v24 = vpop.f32.mrf.mxu3 }
 0x23f   :  { %v452_v25 = vmul.f32 %v389_v24, %v137_v41  ;;  %v449_v26 = vpop.f32.mrf.mxu2 }
 0x240   :  { %v455_v27 = vmul.f32 %v449_v26, %v140_v52 }
 0x241   :  { %456 = vst [vmem:[%s736_s9] sm:$0xff] %v452_v25 }
 0x242   :  { %459 = vst [vmem:[%s736_s9 + $0x18] sm:$0xff] %v455_v27 }
 0x246   :  { %v480_v28 = vpop.f32.mrf.mxu3 }
 0x247   :  { %v483_v29 = vmul.f32 %v480_v28, %v174_v49 }
 0x249   :  { %484 = vst [vmem:[%s737_s10] sm:$0xff] %v483_v29 }

</bundles_post_ra>
